<compile_context>
chip_gen: v7x
topology: tpu7x:2x2x1
jax: 0.10.0
libtpu: 0.0.40
codegen_flags: <defaults>
</compile_context>

<pallas_src>
import jax
import jax.numpy as jnp
from jax import lax
from jax.experimental import pallas as pl
from jax.experimental.pallas import tpu as pltpu


def _round_up(x, m):
    return (x + m - 1) // m * m


def _full_spec(shape):
    """BlockSpec for a small weight that is loaded whole on every grid step."""
    zeros = (0,) * len(shape)
    return pl.BlockSpec(shape, lambda *_, z=zeros: z)


# -----------------------------------------------------------------------------------
# Kernel 1: intra path.
#   For a block of NB (b, t) rows: BiLSTM over F -> FC -> LayerNorm([F, H]) -> +input.
#   Layout is frequency-major (F, N, C) so the recurrence indexes the leading dim.
# -----------------------------------------------------------------------------------
def _intra_kernel(x_ref, wih_ref, whhf_ref, whhb_ref, bias_ref,
                  fcw_ref, fcb_ref, gamma_ref, beta_ref,
                  o_ref, gate_scr, hf_scr, hb_scr):
    F, NB, C = x_ref.shape
    H = fcb_ref.shape[-1]
    Hh = H // 2
    G = 4 * Hh                       # gates per direction

    x = x_ref[...]                                                      # (F, NB, C)

    # One lane-dense input projection for all F steps and both directions:
    # output width 2*G = 4*H (128 lanes for H = 32); bias (b_ih + b_hh) fused.
    gates = jnp.dot(x.reshape(F * NB, C), wih_ref[...],
                    preferred_element_type=jnp.float32) + bias_ref[...]
    gate_scr[...] = gates.reshape(F, NB, 2 * G)

    whh_f = whhf_ref[...]                                               # (Hh, G)
    whh_b = whhb_ref[...]

    def cell(g, c):
        i_g = jax.nn.sigmoid(g[:, 0 * Hh:1 * Hh])
        f_g = jax.nn.sigmoid(g[:, 1 * Hh:2 * Hh])
        c_g = jnp.tanh(g[:, 2 * Hh:3 * Hh])
        o_g = jax.nn.sigmoid(g[:, 3 * Hh:4 * Hh])
        c_new = f_g * c + i_g * c_g
        return o_g * jnp.tanh(c_new), c_new

    def step(f, carry):
        h_f, c_f, h_b, c_b = carry
        gf = gate_scr[f][:, :G] + jnp.dot(h_f, whh_f,
                                          preferred_element_type=jnp.float32)
        gb = gate_scr[F - 1 - f][:, G:] + jnp.dot(h_b, whh_b,
                                                  preferred_element_type=jnp.float32)
        h_f, c_f = cell(gf, c_f)
        h_b, c_b = cell(gb, c_b)
        hf_scr[f] = h_f                       # forward hidden at position f
        hb_scr[F - 1 - f] = h_b               # backward hidden at position F-1-f
        return h_f, c_f, h_b, c_b

    z = jnp.zeros((NB, Hh), jnp.float32)
    lax.fori_loop(0, F, step, (z, z, z, z))

    hid = jnp.concatenate([hf_scr[...], hb_scr[...]], axis=-1)          # (F, NB, H)

    # FC (bias fused) + LayerNorm([F, H]) per (b, t) row + residual, all in VMEM.
    y = jnp.dot(hid.reshape(F * NB, H), fcw_ref[...],
                preferred_element_type=jnp.float32) + fcb_ref[...]
    y = y.reshape(F, NB, H)

    inv_fh = 1.0 / (F * H)
    s = jnp.sum(jnp.sum(y, axis=2, keepdims=True), axis=0, keepdims=True)
    mean = s * inv_fh                                                   # (1, NB, 1)
    d = y - mean
    v = jnp.sum(jnp.sum(d * d, axis=2, keepdims=True), axis=0, keepdims=True)
    y = d * lax.rsqrt(v * inv_fh + 1e-5)
    y = y * gamma_ref[...] + beta_ref[...]

    o_ref[...] = x + y


# -----------------------------------------------------------------------------------
# Kernel 2: inter path.
#   For one batch element: LSTM over T (batch = F rows) -> FC -> LayerNorm([F, H])
#   -> +intra_out.  Layout is time-major (T, F, H).
# -----------------------------------------------------------------------------------
def _inter_kernel(x_ref, wih_ref, whh_ref, bias_ref,
                  fcw_ref, fcb_ref, gamma_ref, beta_ref,
                  o_ref, gate_scr, h_scr):
    T, F, H = x_ref.shape

    x = x_ref[...]                                                      # (T, F, H)

    gates = jnp.dot(x.reshape(T * F, H), wih_ref[...],
                    preferred_element_type=jnp.float32) + bias_ref[...]
    gate_scr[...] = gates.reshape(T, F, 4 * H)

    whh = whh_ref[...]                                                  # (H, 4H)

    def step(t, carry):
        h, c = carry
        g = gate_scr[t] + jnp.dot(h, whh, preferred_element_type=jnp.float32)
        i_g = jax.nn.sigmoid(g[:, 0 * H:1 * H])
        f_g = jax.nn.sigmoid(g[:, 1 * H:2 * H])
        c_g = jnp.tanh(g[:, 2 * H:3 * H])
        o_g = jax.nn.sigmoid(g[:, 3 * H:4 * H])
        c = f_g * c + i_g * c_g
        h = o_g * jnp.tanh(c)
        h_scr[t] = h
        return h, c

    z = jnp.zeros((F, H), jnp.float32)
    lax.fori_loop(0, T, step, (z, z))

    y = jnp.dot(h_scr[...].reshape(T * F, H), fcw_ref[...],
                preferred_element_type=jnp.float32) + fcb_ref[...]
    y = y.reshape(T, F, H)

    inv_fh = 1.0 / (F * H)
    s = jnp.sum(jnp.sum(y, axis=2, keepdims=True), axis=1, keepdims=True)
    mean = s * inv_fh                                                   # (T, 1, 1)
    d = y - mean
    v = jnp.sum(jnp.sum(d * d, axis=2, keepdims=True), axis=1, keepdims=True)
    y = d * lax.rsqrt(v * inv_fh + 1e-5)
    y = y * gamma_ref[...] + beta_ref[...]

    o_ref[...] = x + y


# -----------------------------------------------------------------------------------
# Forward wrapper
# -----------------------------------------------------------------------------------
@jax.jit
def dprnn_forward(x, params):
    """x: (B, C, F, T) with C == hidden_ch (required by the PyTorch module's reshape)."""
    B, C, F, T = x.shape
    H = C
    Hh = H // 2

    # ------------------------------- intra path -------------------------------------
    NB = 8                                      # (b, t) rows per grid step
    N1 = B * T
    N1p = _round_up(N1, NB)
    x_fm = jnp.transpose(x, (2, 0, 3, 1)).reshape(F, N1, C)             # (F, B*T, C)
    if N1p != N1:
        x_fm = jnp.pad(x_fm, ((0, 0), (0, N1p - N1), (0, 0)))

    wih_i = jnp.concatenate([params["intra_w_ih_f"],
                             params["intra_w_ih_b"]], axis=0).T         # (C, 4H)
    bias_i = jnp.concatenate([params["intra_b_ih_f"] + params["intra_b_hh_f"],
                              params["intra_b_ih_b"] + params["intra_b_hh_b"]])[None, :]
    whhf = params["intra_w_hh_f"].T                                     # (Hh, 4Hh)
    whhb = params["intra_w_hh_b"].T
    fcw_i = params["intra_fc_w"].T                                      # (H, H)
    fcb_i = params["intra_fc_b"][None, :]
    gam_i = params["intra_ln_g"][:, None, :]                            # (F, 1, H)
    bet_i = params["intra_ln_b"][:, None, :]

    intra_out = pl.pallas_call(
        _intra_kernel,
        out_shape=jax.ShapeDtypeStruct((F, N1p, H), jnp.float32),
        grid=(N1p // NB,),
        in_specs=[
            pl.BlockSpec((F, NB, C), lambda i: (0, i, 0)),
            _full_spec(wih_i.shape),
            _full_spec(whhf.shape),
            _full_spec(whhb.shape),
            _full_spec(bias_i.shape),
            _full_spec(fcw_i.shape),
            _full_spec(fcb_i.shape),
            _full_spec(gam_i.shape),
            _full_spec(bet_i.shape),
        ],
        out_specs=pl.BlockSpec((F, NB, H), lambda i: (0, i, 0)),
        scratch_shapes=[
            pltpu.VMEM((F, NB, 4 * H), jnp.float32),   # fwd||bwd gates, time(F)-major
            pltpu.VMEM((F, NB, Hh), jnp.float32),      # forward hidden sequence
            pltpu.VMEM((F, NB, Hh), jnp.float32),      # backward hidden sequence
        ],
        compiler_params=pltpu.CompilerParams(dimension_semantics=("parallel",)),
    )(x_fm, wih_i, whhf, whhb, bias_i, fcw_i, fcb_i, gam_i, bet_i)

    # (F, B*T, H) -> (B, T, F, H): the module's own permute, done once in XLA.
    intra_btfh = intra_out[:, :N1].reshape(F, B, T, H).transpose(1, 2, 0, 3)

    # ------------------------------- inter path -------------------------------------
    wih_e = params["inter_w_ih"].T                                      # (H, 4H)
    whh_e = params["inter_w_hh"].T
    bias_e = (params["inter_b_ih"] + params["inter_b_hh"])[None, :]
    fcw_e = params["inter_fc_w"].T
    fcb_e = params["inter_fc_b"][None, :]
    gam_e = params["inter_ln_g"][None, :, :]                            # (1, F, H)
    bet_e = params["inter_ln_b"][None, :, :]

    out_btfh = pl.pallas_call(
        _inter_kernel,
        out_shape=jax.ShapeDtypeStruct((B, T, F, H), jnp.float32),
        grid=(B,),
        in_specs=[
            pl.BlockSpec((None, T, F, H), lambda b: (b, 0, 0, 0)),
            _full_spec(wih_e.shape),
            _full_spec(whh_e.shape),
            _full_spec(bias_e.shape),
            _full_spec(fcw_e.shape),
            _full_spec(fcb_e.shape),
            _full_spec(gam_e.shape),
            _full_spec(bet_e.shape),
        ],
        out_specs=pl.BlockSpec((None, T, F, H), lambda b: (b, 0, 0, 0)),
        scratch_shapes=[
            pltpu.VMEM((T, F, 4 * H), jnp.float32),    # gates, time(T)-major
            pltpu.VMEM((T, F, H), jnp.float32),        # hidden sequence
        ],
        compiler_params=pltpu.CompilerParams(dimension_semantics=("parallel",)),
    )(intra_btfh, wih_e, whh_e, bias_e, fcw_e, fcb_e, gam_e, bet_e)

    return jnp.transpose(out_btfh, (0, 3, 2, 1))                        # (B, C, F, T)


# -----------------------------------------------------------------------------------
# Deterministic parameters (PyTorch layouts) and a pure-JAX reference for validation
# -----------------------------------------------------------------------------------
def init_params(key, C, F, H):
    Hh = H // 2

    def nrm(k, shape, scale=0.1):
        return scale * jax.random.normal(k, shape, jnp.float32)

    ks = jax.random.split(key, 20)
    return {
        "intra_w_ih_f": nrm(ks[0], (4 * Hh, C)),
        "intra_w_hh_f": nrm(ks[1], (4 * Hh, Hh)),
        "intra_b_ih_f": nrm(ks[2], (4 * Hh,)),
        "intra_b_hh_f": nrm(ks[3], (4 * Hh,)),
        "intra_w_ih_b": nrm(ks[4], (4 * Hh, C)),
        "intra_w_hh_b": nrm(ks[5], (4 * Hh, Hh)),
        "intra_b_ih_b": nrm(ks[6], (4 * Hh,)),
        "intra_b_hh_b": nrm(ks[7], (4 * Hh,)),
        "intra_fc_w": nrm(ks[8], (H, H)),
        "intra_fc_b": nrm(ks[9], (H,)),
        "intra_ln_g": 1.0 + nrm(ks[10], (F, H), 0.05),
        "intra_ln_b": nrm(ks[11], (F, H), 0.05),
        "inter_w_ih": nrm(ks[12], (4 * H, H)),
        "inter_w_hh": nrm(ks[13], (4 * H, H)),
        "inter_b_ih": nrm(ks[14], (4 * H,)),
        "inter_b_hh": nrm(ks[15], (4 * H,)),
        "inter_fc_w": nrm(ks[16], (H, H)),
        "inter_fc_b": nrm(ks[17], (H,)),
        "inter_ln_g": 1.0 + nrm(ks[18], (F, H), 0.05),
        "inter_ln_b": nrm(ks[19], (F, H), 0.05),
    }


def _ref_lstm(x, w_ih, w_hh, b_ih, b_hh):
    """Single-layer unidirectional LSTM (PyTorch gate order i, f, g, o), zero init state."""
    N, _, _ = x.shape
    Hn = w_hh.shape[1]

    def step(carry, xt):
        h, c = carry
        g = xt @ w_ih.T + b_ih + h @ w_hh.T + b_hh
        i, f, gg, o = jnp.split(g, 4, axis=-1)
        i = jax.nn.sigmoid(i)
        f = jax.nn.sigmoid(f)
        gg = jnp.tanh(gg)
        o = jax.nn.sigmoid(o)
        c = f * c + i * gg
        h = o * jnp.tanh(c)
        return (h, c), h

    h0 = jnp.zeros((N, Hn), jnp.float32)
    c0 = jnp.zeros((N, Hn), jnp.float32)
    _, hs = lax.scan(step, (h0, c0), jnp.swapaxes(x, 0, 1))
    return jnp.swapaxes(hs, 0, 1)


def _ref_layernorm2(x, g, b, eps=1e-5):
    mean = jnp.mean(x, axis=(-2, -1), keepdims=True)
    var = jnp.mean(jnp.square(x - mean), axis=(-2, -1), keepdims=True)
    return (x - mean) * lax.rsqrt(var + eps) * g + b


@jax.jit
def dprnn_reference(x, p):
    B, C, F, T = x.shape
    H = C
    xp = jnp.transpose(x, (0, 3, 2, 1))                                 # (B, T, F, C)
    intra_in = xp.reshape(B * T, F, C)
    out_f = _ref_lstm(intra_in, p["intra_w_ih_f"], p["intra_w_hh_f"],
                      p["intra_b_ih_f"], p["intra_b_hh_f"])
    out_b = _ref_lstm(intra_in[:, ::-1], p["intra_w_ih_b"], p["intra_w_hh_b"],
                      p["intra_b_ih_b"], p["intra_b_hh_b"])[:, ::-1]
    rnn = jnp.concatenate([out_f, out_b], axis=-1)
    fc = rnn @ p["intra_fc_w"].T + p["intra_fc_b"]
    ln = _ref_layernorm2(fc.reshape(B, T, F, H), p["intra_ln_g"], p["intra_ln_b"])
    intra_out = xp + ln
    inter_in = jnp.transpose(intra_out, (0, 2, 1, 3)).reshape(B * F, T, H)
    rnn2 = _ref_lstm(inter_in, p["inter_w_ih"], p["inter_w_hh"],
                     p["inter_b_ih"], p["inter_b_hh"])
    fc2 = rnn2 @ p["inter_fc_w"].T + p["inter_fc_b"]
    fc2 = jnp.transpose(fc2.reshape(B, F, T, H), (0, 2, 1, 3))
    ln2 = _ref_layernorm2(fc2, p["inter_ln_g"], p["inter_ln_b"])
    return jnp.transpose(intra_out + ln2, (0, 3, 2, 1))


# -----------------------------------------------------------------------------------
# main
# -----------------------------------------------------------------------------------
if __name__ == "__main__":
    # DPRnn(input_ch=C, F_dim=F, hidden_ch=C): the module's reshape/residual requires
    # hidden_ch == input_ch, so pick C = hidden = 32, F = 16 frequency bins, T = 8 frames.
    B, C, F, T = 2, 32, 16, 8
    key = jax.random.PRNGKey(0)
    params = init_params(key, C, F, C)
    x = jax.random.normal(jax.random.fold_in(key, 1234), (B, C, F, T), jnp.float32)

    y = dprnn_forward(x, params)
    jax.block_until_ready(y)

    y_ref = dprnn_reference(x, params)
    err = float(jnp.max(jnp.abs(y - y_ref)))
    if not (err < 1e-3):
        raise AssertionError(f"Pallas DPRnn mismatch vs pure-JAX reference: max|diff|={err}")
    print("KERNEL_OK")
</pallas_src>

<mosaic_0001>
module attributes {stable_mosaic.version = 11 : i64} {
  func.func @_intra_kernel(%arg0: i32, %arg1: memref<16x8x32xf32, #tpu.memory_space<vmem>>, %arg2: memref<32x128xf32, #tpu.memory_space<vmem>>, %arg3: memref<16x64xf32, #tpu.memory_space<vmem>>, %arg4: memref<16x64xf32, #tpu.memory_space<vmem>>, %arg5: memref<1x128xf32, #tpu.memory_space<vmem>>, %arg6: memref<32x32xf32, #tpu.memory_space<vmem>>, %arg7: memref<1x32xf32, #tpu.memory_space<vmem>>, %arg8: memref<16x1x32xf32, #tpu.memory_space<vmem>>, %arg9: memref<16x1x32xf32, #tpu.memory_space<vmem>>, %arg10: memref<16x8x32xf32, #tpu.memory_space<vmem>>, %arg11: memref<16x8x128xf32, #tpu.memory_space<vmem>>, %arg12: memref<16x8x16xf32, #tpu.memory_space<vmem>>, %arg13: memref<16x8x16xf32, #tpu.memory_space<vmem>>) attributes {dimension_semantics = [#tpu.dimension_semantics<parallel>], iteration_bounds = array<i64: 2>, scalar_prefetch = 0 : i64, scratch_operands = 3 : i64, tpu.core_type = #tpu.core_type<tc>, window_params = [{transform_indices = @transform_0, window_bounds = array<i64: 16, 8, 32>}, {pipeline_mode = #tpu.pipeline_mode<synchronous>, transform_indices = @transform_1, window_bounds = array<i64: 32, 128>}, {pipeline_mode = #tpu.pipeline_mode<synchronous>, transform_indices = @transform_2, window_bounds = array<i64: 16, 64>}, {pipeline_mode = #tpu.pipeline_mode<synchronous>, transform_indices = @transform_3, window_bounds = array<i64: 16, 64>}, {pipeline_mode = #tpu.pipeline_mode<synchronous>, transform_indices = @transform_4, window_bounds = array<i64: 1, 128>}, {pipeline_mode = #tpu.pipeline_mode<synchronous>, transform_indices = @transform_5, window_bounds = array<i64: 32, 32>}, {pipeline_mode = #tpu.pipeline_mode<synchronous>, transform_indices = @transform_6, window_bounds = array<i64: 1, 32>}, {pipeline_mode = #tpu.pipeline_mode<synchronous>, transform_indices = @transform_7, window_bounds = array<i64: 16, 1, 32>}, {pipeline_mode = #tpu.pipeline_mode<synchronous>, transform_indices = @transform_8, window_bounds = array<i64: 16, 1, 32>}, {transform_indices = @transform_9, window_bounds = array<i64: 16, 8, 32>}]} {
    %c0 = arith.constant 0 : index
    %c0_0 = arith.constant 0 : index
    %c0_1 = arith.constant 0 : index
    %0 = vector.load %arg1[%c0, %c0_0, %c0_1] : memref<16x8x32xf32, #tpu.memory_space<vmem>>, vector<16x8x32xf32>
    %1 = vector.shape_cast %0 : vector<16x8x32xf32> to vector<128x32xf32>
    %c0_2 = arith.constant 0 : index
    %c0_3 = arith.constant 0 : index
    %2 = vector.load %arg2[%c0_2, %c0_3] : memref<32x128xf32, #tpu.memory_space<vmem>>, vector<32x128xf32>
    %cst = arith.constant dense<0.000000e+00> : vector<128x128xf32>
    %3 = tpu.matmul %1, %2, %cst {dimension_numbers = #tpu.dot_dimension_numbers<[1], [0], [0], [1], [0, 0, 1, 1], [], []>} : vector<128x32xf32>, vector<32x128xf32>, vector<128x128xf32> -> vector<128x128xf32>
    %c0_4 = arith.constant 0 : index
    %c0_5 = arith.constant 0 : index
    %4 = vector.load %arg5[%c0_4, %c0_5] : memref<1x128xf32, #tpu.memory_space<vmem>>, vector<1x128xf32>
    %5 = vector.broadcast %4 : vector<1x128xf32> to vector<128x128xf32>
    %6 = arith.addf %3, %5 : vector<128x128xf32>
    %7 = vector.shape_cast %6 : vector<128x128xf32> to vector<16x8x128xf32>
    %c0_6 = arith.constant 0 : index
    %c0_7 = arith.constant 0 : index
    %c0_8 = arith.constant 0 : index
    %8 = vector.load %arg11[%c0_6, %c0_7, %c0_8] : memref<16x8x128xf32, #tpu.memory_space<vmem>>, vector<16x8x128xf32>
    tpu.vector_store %arg11[%c0_6, %c0_7, %c0_8], %7 {strides = array<i32>} : memref<16x8x128xf32, #tpu.memory_space<vmem>>, vector<16x8x128xf32>,
    %c0_9 = arith.constant 0 : index
    %c0_10 = arith.constant 0 : index
    %9 = vector.load %arg3[%c0_9, %c0_10] : memref<16x64xf32, #tpu.memory_space<vmem>>, vector<16x64xf32>
    %c0_11 = arith.constant 0 : index
    %c0_12 = arith.constant 0 : index
    %10 = vector.load %arg4[%c0_11, %c0_12] : memref<16x64xf32, #tpu.memory_space<vmem>>, vector<16x64xf32>
    %cst_13 = arith.constant 0.000000e+00 : f32
    %11 = vector.broadcast %cst_13 : f32 to vector<8x16xf32>
    %c0_i32 = arith.constant 0 : i32
    %c16_i32 = arith.constant 16 : i32
    %12 = arith.addi %c0_i32, %c16_i32 : i32
    %c1_i32 = arith.constant 1 : i32
    %13:4 = scf.for %arg14 = %c0_i32 to %12 step %c1_i32 iter_args(%arg15 = %11, %arg16 = %11, %arg17 = %11, %arg18 = %11) -> (vector<8x16xf32>, vector<8x16xf32>, vector<8x16xf32>, vector<8x16xf32>)  : i32 {
      %52 = arith.index_cast %arg14 : i32 to index
      %c0_42 = arith.constant 0 : index
      %c0_43 = arith.constant 0 : index
      %53 = vector.load %arg11[%52, %c0_42, %c0_43] : memref<16x8x128xf32, #tpu.memory_space<vmem>>, vector<1x8x128xf32>
      %54 = vector.shape_cast %53 : vector<1x8x128xf32> to vector<8x128xf32>
      %55 = vector.extract_strided_slice %54 {offsets = [0, 0], sizes = [8, 64], strides = [1, 1]} : vector<8x128xf32> to vector<8x64xf32>
      %cst_44 = arith.constant dense<0.000000e+00> : vector<8x64xf32>
      %56 = tpu.matmul %arg15, %9, %cst_44 {dimension_numbers = #tpu.dot_dimension_numbers<[1], [0], [0], [1], [0, 0, 1, 1], [], []>} : vector<8x16xf32>, vector<16x64xf32>, vector<8x64xf32> -> vector<8x64xf32>
      %57 = arith.addf %55, %56 : vector<8x64xf32>
      %c15_i32 = arith.constant 15 : i32
      %58 = arith.subi %c15_i32, %arg14 : i32
      %59 = arith.index_cast %58 : i32 to index
      %c0_45 = arith.constant 0 : index
      %c0_46 = arith.constant 0 : index
      %60 = vector.load %arg11[%59, %c0_45, %c0_46] : memref<16x8x128xf32, #tpu.memory_space<vmem>>, vector<1x8x128xf32>
      %61 = vector.shape_cast %60 : vector<1x8x128xf32> to vector<8x128xf32>
      %62 = vector.extract_strided_slice %61 {offsets = [0, 64], sizes = [8, 64], strides = [1, 1]} : vector<8x128xf32> to vector<8x64xf32>
      %cst_47 = arith.constant dense<0.000000e+00> : vector<8x64xf32>
      %63 = tpu.matmul %arg17, %10, %cst_47 {dimension_numbers = #tpu.dot_dimension_numbers<[1], [0], [0], [1], [0, 0, 1, 1], [], []>} : vector<8x16xf32>, vector<16x64xf32>, vector<8x64xf32> -> vector<8x64xf32>
      %64 = arith.addf %62, %63 : vector<8x64xf32>
      %65 = vector.extract_strided_slice %57 {offsets = [0, 0], sizes = [8, 16], strides = [1, 1]} : vector<8x64xf32> to vector<8x16xf32>
      %66 = arith.negf %65 : vector<8x16xf32>
      %67 = math.exp %66 : vector<8x16xf32>
      %cst_48 = arith.constant 1.000000e+00 : f32
      %68 = vector.broadcast %cst_48 : f32 to vector<8x16xf32>
      %69 = arith.addf %68, %67 : vector<8x16xf32>
      %70 = arith.divf %68, %69 : vector<8x16xf32>
      %71 = vector.extract_strided_slice %57 {offsets = [0, 16], sizes = [8, 16], strides = [1, 1]} : vector<8x64xf32> to vector<8x16xf32>
      %72 = arith.negf %71 : vector<8x16xf32>
      %73 = math.exp %72 : vector<8x16xf32>
      %cst_49 = arith.constant 1.000000e+00 : f32
      %74 = vector.broadcast %cst_49 : f32 to vector<8x16xf32>
      %75 = arith.addf %74, %73 : vector<8x16xf32>
      %76 = arith.divf %74, %75 : vector<8x16xf32>
      %77 = vector.extract_strided_slice %57 {offsets = [0, 32], sizes = [8, 16], strides = [1, 1]} : vector<8x64xf32> to vector<8x16xf32>
      %78 = math.tanh %77 : vector<8x16xf32>
      %79 = vector.extract_strided_slice %57 {offsets = [0, 48], sizes = [8, 16], strides = [1, 1]} : vector<8x64xf32> to vector<8x16xf32>
      %80 = arith.negf %79 : vector<8x16xf32>
      %81 = math.exp %80 : vector<8x16xf32>
      %cst_50 = arith.constant 1.000000e+00 : f32
      %82 = vector.broadcast %cst_50 : f32 to vector<8x16xf32>
      %83 = arith.addf %82, %81 : vector<8x16xf32>
      %84 = arith.divf %82, %83 : vector<8x16xf32>
      %85 = arith.mulf %76, %arg16 : vector<8x16xf32>
      %86 = arith.mulf %70, %78 : vector<8x16xf32>
      %87 = arith.addf %85, %86 : vector<8x16xf32>
      %88 = math.tanh %87 : vector<8x16xf32>
      %89 = arith.mulf %84, %88 : vector<8x16xf32>
      %90 = vector.extract_strided_slice %64 {offsets = [0, 0], sizes = [8, 16], strides = [1, 1]} : vector<8x64xf32> to vector<8x16xf32>
      %91 = arith.negf %90 : vector<8x16xf32>
      %92 = math.exp %91 : vector<8x16xf32>
      %cst_51 = arith.constant 1.000000e+00 : f32
      %93 = vector.broadcast %cst_51 : f32 to vector<8x16xf32>
      %94 = arith.addf %93, %92 : vector<8x16xf32>
      %95 = arith.divf %93, %94 : vector<8x16xf32>
      %96 = vector.extract_strided_slice %64 {offsets = [0, 16], sizes = [8, 16], strides = [1, 1]} : vector<8x64xf32> to vector<8x16xf32>
      %97 = arith.negf %96 : vector<8x16xf32>
      %98 = math.exp %97 : vector<8x16xf32>
      %cst_52 = arith.constant 1.000000e+00 : f32
      %99 = vector.broadcast %cst_52 : f32 to vector<8x16xf32>
      %100 = arith.addf %99, %98 : vector<8x16xf32>
      %101 = arith.divf %99, %100 : vector<8x16xf32>
      %102 = vector.extract_strided_slice %64 {offsets = [0, 32], sizes = [8, 16], strides = [1, 1]} : vector<8x64xf32> to vector<8x16xf32>
      %103 = math.tanh %102 : vector<8x16xf32>
      %104 = vector.extract_strided_slice %64 {offsets = [0, 48], sizes = [8, 16], strides = [1, 1]} : vector<8x64xf32> to vector<8x16xf32>
      %105 = arith.negf %104 : vector<8x16xf32>
      %106 = math.exp %105 : vector<8x16xf32>
      %cst_53 = arith.constant 1.000000e+00 : f32
      %107 = vector.broadcast %cst_53 : f32 to vector<8x16xf32>
      %108 = arith.addf %107, %106 : vector<8x16xf32>
      %109 = arith.divf %107, %108 : vector<8x16xf32>
      %110 = arith.mulf %101, %arg18 : vector<8x16xf32>
      %111 = arith.mulf %95, %103 : vector<8x16xf32>
      %112 = arith.addf %110, %111 : vector<8x16xf32>
      %113 = math.tanh %112 : vector<8x16xf32>
      %114 = arith.mulf %109, %113 : vector<8x16xf32>
      %115 = arith.index_cast %arg14 : i32 to index
      %c0_54 = arith.constant 0 : index
      %c0_55 = arith.constant 0 : index
      %116 = vector.load %arg12[%115, %c0_54, %c0_55] : memref<16x8x16xf32, #tpu.memory_space<vmem>>, vector<1x8x16xf32>
      %117 = vector.shape_cast %116 : vector<1x8x16xf32> to vector<8x16xf32>
      %118 = vector.shape_cast %89 : vector<8x16xf32> to vector<1x8x16xf32>
      tpu.vector_store %arg12[%115, %c0_54, %c0_55], %118 {strides = array<i32>} : memref<16x8x16xf32, #tpu.memory_space<vmem>>, vector<1x8x16xf32>,
      %c15_i32_56 = arith.constant 15 : i32
      %119 = arith.subi %c15_i32_56, %arg14 : i32
      %120 = arith.index_cast %119 : i32 to index
      %c0_57 = arith.constant 0 : index
      %c0_58 = arith.constant 0 : index
      %121 = vector.load %arg13[%120, %c0_57, %c0_58] : memref<16x8x16xf32, #tpu.memory_space<vmem>>, vector<1x8x16xf32>
      %122 = vector.shape_cast %121 : vector<1x8x16xf32> to vector<8x16xf32>
      %123 = vector.shape_cast %114 : vector<8x16xf32> to vector<1x8x16xf32>
      tpu.vector_store %arg13[%120, %c0_57, %c0_58], %123 {strides = array<i32>} : memref<16x8x16xf32, #tpu.memory_space<vmem>>, vector<1x8x16xf32>,
      scf.yield %89, %87, %114, %112 : vector<8x16xf32>, vector<8x16xf32>, vector<8x16xf32>, vector<8x16xf32>
    }
    %c16_i32_14 = arith.constant 16 : i32
    %c0_15 = arith.constant 0 : index
    %c0_16 = arith.constant 0 : index
    %c0_17 = arith.constant 0 : index
    %14 = vector.load %arg12[%c0_15, %c0_16, %c0_17] : memref<16x8x16xf32, #tpu.memory_space<vmem>>, vector<16x8x16xf32>
    %c0_18 = arith.constant 0 : index
    %c0_19 = arith.constant 0 : index
    %c0_20 = arith.constant 0 : index
    %15 = vector.load %arg13[%c0_18, %c0_19, %c0_20] : memref<16x8x16xf32, #tpu.memory_space<vmem>>, vector<16x8x16xf32>
    %16 = tpu.concatenate %14, %15 in 2 : vector<16x8x16xf32>, vector<16x8x16xf32> -> vector<16x8x32xf32>
    %17 = vector.shape_cast %16 : vector<16x8x32xf32> to vector<128x32xf32>
    %c0_21 = arith.constant 0 : index
    %c0_22 = arith.constant 0 : index
    %18 = vector.load %arg6[%c0_21, %c0_22] : memref<32x32xf32, #tpu.memory_space<vmem>>, vector<32x32xf32>
    %cst_23 = arith.constant dense<0.000000e+00> : vector<128x32xf32>
    %19 = tpu.matmul %17, %18, %cst_23 {dimension_numbers = #tpu.dot_dimension_numbers<[1], [0], [0], [1], [0, 0, 1, 1], [], []>} : vector<128x32xf32>, vector<32x32xf32>, vector<128x32xf32> -> vector<128x32xf32>
    %c0_24 = arith.constant 0 : index
    %c0_25 = arith.constant 0 : index
    %20 = vector.load %arg7[%c0_24, %c0_25] : memref<1x32xf32, #tpu.memory_space<vmem>>, vector<1x32xf32>
    %21 = vector.broadcast %20 : vector<1x32xf32> to vector<128x32xf32>
    %22 = arith.addf %19, %21 : vector<128x32xf32>
    %23 = vector.shape_cast %22 : vector<128x32xf32> to vector<16x8x32xf32>
    %cst_26 = arith.constant dense<0.000000e+00> : vector<16x8xf32>
    %24 = vector.multi_reduction <add>, %23, %cst_26 [2] : vector<16x8x32xf32> to vector<16x8xf32>
    %25 = vector.shape_cast %24 : vector<16x8xf32> to vector<16x8x1xf32>
    %cst_27 = arith.constant dense<0.000000e+00> : vector<8x1xf32>
    %26 = vector.multi_reduction <add>, %25, %cst_27 [0] : vector<16x8x1xf32> to vector<8x1xf32>
    %27 = vector.shape_cast %26 : vector<8x1xf32> to vector<1x8x1xf32>
    %cst_28 = arith.constant 0.001953125 : f32
    %28 = vector.broadcast %cst_28 : f32 to vector<1x8x1xf32>
    %29 = arith.mulf %27, %28 : vector<1x8x1xf32>
    %30 = vector.broadcast %29 : vector<1x8x1xf32> to vector<16x8x32xf32>
    %31 = arith.subf %23, %30 : vector<16x8x32xf32>
    %32 = arith.mulf %31, %31 : vector<16x8x32xf32>
    %cst_29 = arith.constant dense<0.000000e+00> : vector<16x8xf32>
    %33 = vector.multi_reduction <add>, %32, %cst_29 [2] : vector<16x8x32xf32> to vector<16x8xf32>
    %34 = vector.shape_cast %33 : vector<16x8xf32> to vector<16x8x1xf32>
    %cst_30 = arith.constant dense<0.000000e+00> : vector<8x1xf32>
    %35 = vector.multi_reduction <add>, %34, %cst_30 [0] : vector<16x8x1xf32> to vector<8x1xf32>
    %36 = vector.shape_cast %35 : vector<8x1xf32> to vector<1x8x1xf32>
    %cst_31 = arith.constant 0.001953125 : f32
    %37 = vector.broadcast %cst_31 : f32 to vector<1x8x1xf32>
    %38 = arith.mulf %36, %37 : vector<1x8x1xf32>
    %cst_32 = arith.constant 9.99999974E-6 : f32
    %39 = vector.broadcast %cst_32 : f32 to vector<1x8x1xf32>
    %40 = arith.addf %38, %39 : vector<1x8x1xf32>
    %41 = math.rsqrt %40 : vector<1x8x1xf32>
    %42 = vector.broadcast %41 : vector<1x8x1xf32> to vector<16x8x32xf32>
    %43 = arith.mulf %31, %42 : vector<16x8x32xf32>
    %c0_33 = arith.constant 0 : index
    %c0_34 = arith.constant 0 : index
    %c0_35 = arith.constant 0 : index
    %44 = vector.load %arg8[%c0_33, %c0_34, %c0_35] : memref<16x1x32xf32, #tpu.memory_space<vmem>>, vector<16x1x32xf32>
    %45 = vector.broadcast %44 : vector<16x1x32xf32> to vector<16x8x32xf32>
    %46 = arith.mulf %43, %45 : vector<16x8x32xf32>
    %c0_36 = arith.constant 0 : index
    %c0_37 = arith.constant 0 : index
    %c0_38 = arith.constant 0 : index
    %47 = vector.load %arg9[%c0_36, %c0_37, %c0_38] : memref<16x1x32xf32, #tpu.memory_space<vmem>>, vector<16x1x32xf32>
    %48 = vector.broadcast %47 : vector<16x1x32xf32> to vector<16x8x32xf32>
    %49 = arith.addf %46, %48 : vector<16x8x32xf32>
    %50 = arith.addf %0, %49 : vector<16x8x32xf32>
    %c0_39 = arith.constant 0 : index
    %c0_40 = arith.constant 0 : index
    %c0_41 = arith.constant 0 : index
    %51 = vector.load %arg10[%c0_39, %c0_40, %c0_41] : memref<16x8x32xf32, #tpu.memory_space<vmem>>, vector<16x8x32xf32>
    tpu.vector_store %arg10[%c0_39, %c0_40, %c0_41], %50 {strides = array<i32>} : memref<16x8x32xf32, #tpu.memory_space<vmem>>, vector<16x8x32xf32>,
    return
  }
  func.func @transform_0(%arg0: i32) -> (i32, i32, i32) {
    %c0_i32 = arith.constant 0 : i32
    %c0_i32_0 = arith.constant 0 : i32
    %c0_i32_1 = arith.constant 0 : i32
    return %c0_i32, %arg0, %c0_i32_0 : i32, i32, i32
  }
  func.func @transform_1(%arg0: i32) -> (i32, i32) {
    %c0_i32 = arith.constant 0 : i32
    %c0_i32_0 = arith.constant 0 : i32
    %c0_i32_1 = arith.constant 0 : i32
    return %c0_i32, %c0_i32_0 : i32, i32
  }
  func.func @transform_2(%arg0: i32) -> (i32, i32) {
    %c0_i32 = arith.constant 0 : i32
    %c0_i32_0 = arith.constant 0 : i32
    %c0_i32_1 = arith.constant 0 : i32
    return %c0_i32, %c0_i32_0 : i32, i32
  }
  func.func @transform_3(%arg0: i32) -> (i32, i32) {
    %c0_i32 = arith.constant 0 : i32
    %c0_i32_0 = arith.constant 0 : i32
    %c0_i32_1 = arith.constant 0 : i32
    return %c0_i32, %c0_i32_0 : i32, i32
  }
  func.func @transform_4(%arg0: i32) -> (i32, i32) {
    %c0_i32 = arith.constant 0 : i32
    %c0_i32_0 = arith.constant 0 : i32
    %c0_i32_1 = arith.constant 0 : i32
    return %c0_i32, %c0_i32_0 : i32, i32
  }
  func.func @transform_5(%arg0: i32) -> (i32, i32) {
    %c0_i32 = arith.constant 0 : i32
    %c0_i32_0 = arith.constant 0 : i32
    %c0_i32_1 = arith.constant 0 : i32
    return %c0_i32, %c0_i32_0 : i32, i32
  }
  func.func @transform_6(%arg0: i32) -> (i32, i32) {
    %c0_i32 = arith.constant 0 : i32
    %c0_i32_0 = arith.constant 0 : i32
    %c0_i32_1 = arith.constant 0 : i32
    return %c0_i32, %c0_i32_0 : i32, i32
  }
  func.func @transform_7(%arg0: i32) -> (i32, i32, i32) {
    %c0_i32 = arith.constant 0 : i32
    %c0_i32_0 = arith.constant 0 : i32
    %c0_i32_1 = arith.constant 0 : i32
    %c0_i32_2 = arith.constant 0 : i32
    return %c0_i32, %c0_i32_0, %c0_i32_1 : i32, i32, i32
  }
  func.func @transform_8(%arg0: i32) -> (i32, i32, i32) {
    %c0_i32 = arith.constant 0 : i32
    %c0_i32_0 = arith.constant 0 : i32
    %c0_i32_1 = arith.constant 0 : i32
    %c0_i32_2 = arith.constant 0 : i32
    return %c0_i32, %c0_i32_0, %c0_i32_1 : i32, i32, i32
  }
  func.func @transform_9(%arg0: i32) -> (i32, i32, i32) {
    %c0_i32 = arith.constant 0 : i32
    %c0_i32_0 = arith.constant 0 : i32
    %c0_i32_1 = arith.constant 0 : i32
    return %c0_i32, %arg0, %c0_i32_0 : i32, i32, i32
  }
}

module attributes {stable_mosaic.version = 11 : i64} {
  func.func @_inter_kernel(%arg0: i32, %arg1: memref<1x8x16x32xf32, #tpu.memory_space<vmem>>, %arg2: memref<32x128xf32, #tpu.memory_space<vmem>>, %arg3: memref<32x128xf32, #tpu.memory_space<vmem>>, %arg4: memref<1x128xf32, #tpu.memory_space<vmem>>, %arg5: memref<32x32xf32, #tpu.memory_space<vmem>>, %arg6: memref<1x32xf32, #tpu.memory_space<vmem>>, %arg7: memref<1x16x32xf32, #tpu.memory_space<vmem>>, %arg8: memref<1x16x32xf32, #tpu.memory_space<vmem>>, %arg9: memref<1x8x16x32xf32, #tpu.memory_space<vmem>>, %arg10: memref<8x16x128xf32, #tpu.memory_space<vmem>>, %arg11: memref<8x16x32xf32, #tpu.memory_space<vmem>>) attributes {dimension_semantics = [#tpu.dimension_semantics<parallel>], iteration_bounds = array<i64: 2>, scalar_prefetch = 0 : i64, scratch_operands = 2 : i64, tpu.core_type = #tpu.core_type<tc>, window_params = [{transform_indices = @transform_0, window_bounds = array<i64: 1, 8, 16, 32>}, {pipeline_mode = #tpu.pipeline_mode<synchronous>, transform_indices = @transform_1, window_bounds = array<i64: 32, 128>}, {pipeline_mode = #tpu.pipeline_mode<synchronous>, transform_indices = @transform_2, window_bounds = array<i64: 32, 128>}, {pipeline_mode = #tpu.pipeline_mode<synchronous>, transform_indices = @transform_3, window_bounds = array<i64: 1, 128>}, {pipeline_mode = #tpu.pipeline_mode<synchronous>, transform_indices = @transform_4, window_bounds = array<i64: 32, 32>}, {pipeline_mode = #tpu.pipeline_mode<synchronous>, transform_indices = @transform_5, window_bounds = array<i64: 1, 32>}, {pipeline_mode = #tpu.pipeline_mode<synchronous>, transform_indices = @transform_6, window_bounds = array<i64: 1, 16, 32>}, {pipeline_mode = #tpu.pipeline_mode<synchronous>, transform_indices = @transform_7, window_bounds = array<i64: 1, 16, 32>}, {transform_indices = @transform_8, window_bounds = array<i64: 1, 8, 16, 32>}]} {
    %c0 = arith.constant 0 : index
    %c0_0 = arith.constant 0 : index
    %c0_1 = arith.constant 0 : index
    %c0_2 = arith.constant 0 : index
    %0 = vector.load %arg1[%c0, %c0_0, %c0_1, %c0_2] : memref<1x8x16x32xf32, #tpu.memory_space<vmem>>, vector<1x8x16x32xf32>
    %1 = vector.shape_cast %0 : vector<1x8x16x32xf32> to vector<8x16x32xf32>
    %2 = vector.shape_cast %1 : vector<8x16x32xf32> to vector<128x32xf32>
    %c0_3 = arith.constant 0 : index
    %c0_4 = arith.constant 0 : index
    %3 = vector.load %arg2[%c0_3, %c0_4] : memref<32x128xf32, #tpu.memory_space<vmem>>, vector<32x128xf32>
    %cst = arith.constant dense<0.000000e+00> : vector<128x128xf32>
    %4 = tpu.matmul %2, %3, %cst {dimension_numbers = #tpu.dot_dimension_numbers<[1], [0], [0], [1], [0, 0, 1, 1], [], []>} : vector<128x32xf32>, vector<32x128xf32>, vector<128x128xf32> -> vector<128x128xf32>
    %c0_5 = arith.constant 0 : index
    %c0_6 = arith.constant 0 : index
    %5 = vector.load %arg4[%c0_5, %c0_6] : memref<1x128xf32, #tpu.memory_space<vmem>>, vector<1x128xf32>
    %6 = vector.broadcast %5 : vector<1x128xf32> to vector<128x128xf32>
    %7 = arith.addf %4, %6 : vector<128x128xf32>
    %8 = vector.shape_cast %7 : vector<128x128xf32> to vector<8x16x128xf32>
    %c0_7 = arith.constant 0 : index
    %c0_8 = arith.constant 0 : index
    %c0_9 = arith.constant 0 : index
    %9 = vector.load %arg10[%c0_7, %c0_8, %c0_9] : memref<8x16x128xf32, #tpu.memory_space<vmem>>, vector<8x16x128xf32>
    tpu.vector_store %arg10[%c0_7, %c0_8, %c0_9], %8 {strides = array<i32>} : memref<8x16x128xf32, #tpu.memory_space<vmem>>, vector<8x16x128xf32>,
    %c0_10 = arith.constant 0 : index
    %c0_11 = arith.constant 0 : index
    %10 = vector.load %arg3[%c0_10, %c0_11] : memref<32x128xf32, #tpu.memory_space<vmem>>, vector<32x128xf32>
    %cst_12 = arith.constant 0.000000e+00 : f32
    %11 = vector.broadcast %cst_12 : f32 to vector<16x32xf32>
    %c0_i32 = arith.constant 0 : i32
    %c8_i32 = arith.constant 8 : i32
    %12 = arith.addi %c0_i32, %c8_i32 : i32
    %c1_i32 = arith.constant 1 : i32
    %13:2 = scf.for %arg12 = %c0_i32 to %12 step %c1_i32 iter_args(%arg13 = %11, %arg14 = %11) -> (vector<16x32xf32>, vector<16x32xf32>)  : i32 {
      %52 = arith.index_cast %arg12 : i32 to index
      %c0_39 = arith.constant 0 : index
      %c0_40 = arith.constant 0 : index
      %53 = vector.load %arg10[%52, %c0_39, %c0_40] : memref<8x16x128xf32, #tpu.memory_space<vmem>>, vector<1x16x128xf32>
      %54 = vector.shape_cast %53 : vector<1x16x128xf32> to vector<16x128xf32>
      %cst_41 = arith.constant dense<0.000000e+00> : vector<16x128xf32>
      %55 = tpu.matmul %arg13, %10, %cst_41 {dimension_numbers = #tpu.dot_dimension_numbers<[1], [0], [0], [1], [0, 0, 1, 1], [], []>} : vector<16x32xf32>, vector<32x128xf32>, vector<16x128xf32> -> vector<16x128xf32>
      %56 = arith.addf %54, %55 : vector<16x128xf32>
      %57 = vector.extract_strided_slice %56 {offsets = [0, 0], sizes = [16, 32], strides = [1, 1]} : vector<16x128xf32> to vector<16x32xf32>
      %58 = arith.negf %57 : vector<16x32xf32>
      %59 = math.exp %58 : vector<16x32xf32>
      %cst_42 = arith.constant 1.000000e+00 : f32
      %60 = vector.broadcast %cst_42 : f32 to vector<16x32xf32>
      %61 = arith.addf %60, %59 : vector<16x32xf32>
      %62 = arith.divf %60, %61 : vector<16x32xf32>
      %63 = vector.extract_strided_slice %56 {offsets = [0, 32], sizes = [16, 32], strides = [1, 1]} : vector<16x128xf32> to vector<16x32xf32>
      %64 = arith.negf %63 : vector<16x32xf32>
      %65 = math.exp %64 : vector<16x32xf32>
      %cst_43 = arith.constant 1.000000e+00 : f32
      %66 = vector.broadcast %cst_43 : f32 to vector<16x32xf32>
      %67 = arith.addf %66, %65 : vector<16x32xf32>
      %68 = arith.divf %66, %67 : vector<16x32xf32>
      %69 = vector.extract_strided_slice %56 {offsets = [0, 64], sizes = [16, 32], strides = [1, 1]} : vector<16x128xf32> to vector<16x32xf32>
      %70 = math.tanh %69 : vector<16x32xf32>
      %71 = vector.extract_strided_slice %56 {offsets = [0, 96], sizes = [16, 32], strides = [1, 1]} : vector<16x128xf32> to vector<16x32xf32>
      %72 = arith.negf %71 : vector<16x32xf32>
      %73 = math.exp %72 : vector<16x32xf32>
      %cst_44 = arith.constant 1.000000e+00 : f32
      %74 = vector.broadcast %cst_44 : f32 to vector<16x32xf32>
      %75 = arith.addf %74, %73 : vector<16x32xf32>
      %76 = arith.divf %74, %75 : vector<16x32xf32>
      %77 = arith.mulf %68, %arg14 : vector<16x32xf32>
      %78 = arith.mulf %62, %70 : vector<16x32xf32>
      %79 = arith.addf %77, %78 : vector<16x32xf32>
      %80 = math.tanh %79 : vector<16x32xf32>
      %81 = arith.mulf %76, %80 : vector<16x32xf32>
      %82 = arith.index_cast %arg12 : i32 to index
      %c0_45 = arith.constant 0 : index
      %c0_46 = arith.constant 0 : index
      %83 = vector.load %arg11[%82, %c0_45, %c0_46] : memref<8x16x32xf32, #tpu.memory_space<vmem>>, vector<1x16x32xf32>
      %84 = vector.shape_cast %83 : vector<1x16x32xf32> to vector<16x32xf32>
      %85 = vector.shape_cast %81 : vector<16x32xf32> to vector<1x16x32xf32>
      tpu.vector_store %arg11[%82, %c0_45, %c0_46], %85 {strides = array<i32>} : memref<8x16x32xf32, #tpu.memory_space<vmem>>, vector<1x16x32xf32>,
      scf.yield %81, %79 : vector<16x32xf32>, vector<16x32xf32>
    }
    %c8_i32_13 = arith.constant 8 : i32
    %c0_14 = arith.constant 0 : index
    %c0_15 = arith.constant 0 : index
    %c0_16 = arith.constant 0 : index
    %14 = vector.load %arg11[%c0_14, %c0_15, %c0_16] : memref<8x16x32xf32, #tpu.memory_space<vmem>>, vector<8x16x32xf32>
    %15 = vector.shape_cast %14 : vector<8x16x32xf32> to vector<128x32xf32>
    %c0_17 = arith.constant 0 : index
    %c0_18 = arith.constant 0 : index
    %16 = vector.load %arg5[%c0_17, %c0_18] : memref<32x32xf32, #tpu.memory_space<vmem>>, vector<32x32xf32>
    %cst_19 = arith.constant dense<0.000000e+00> : vector<128x32xf32>
    %17 = tpu.matmul %15, %16, %cst_19 {dimension_numbers = #tpu.dot_dimension_numbers<[1], [0], [0], [1], [0, 0, 1, 1], [], []>} : vector<128x32xf32>, vector<32x32xf32>, vector<128x32xf32> -> vector<128x32xf32>
    %c0_20 = arith.constant 0 : index
    %c0_21 = arith.constant 0 : index
    %18 = vector.load %arg6[%c0_20, %c0_21] : memref<1x32xf32, #tpu.memory_space<vmem>>, vector<1x32xf32>
    %19 = vector.broadcast %18 : vector<1x32xf32> to vector<128x32xf32>
    %20 = arith.addf %17, %19 : vector<128x32xf32>
    %21 = vector.shape_cast %20 : vector<128x32xf32> to vector<8x16x32xf32>
    %cst_22 = arith.constant dense<0.000000e+00> : vector<8x16xf32>
    %22 = vector.multi_reduction <add>, %21, %cst_22 [2] : vector<8x16x32xf32> to vector<8x16xf32>
    %23 = vector.shape_cast %22 : vector<8x16xf32> to vector<8x16x1xf32>
    %cst_23 = arith.constant dense<0.000000e+00> : vector<8x1xf32>
    %24 = vector.multi_reduction <add>, %23, %cst_23 [1] : vector<8x16x1xf32> to vector<8x1xf32>
    %25 = vector.shape_cast %24 : vector<8x1xf32> to vector<8x1x1xf32>
    %cst_24 = arith.constant 0.001953125 : f32
    %26 = vector.broadcast %cst_24 : f32 to vector<8x1x1xf32>
    %27 = arith.mulf %25, %26 : vector<8x1x1xf32>
    %28 = vector.broadcast %27 : vector<8x1x1xf32> to vector<8x16x32xf32>
    %29 = arith.subf %21, %28 : vector<8x16x32xf32>
    %30 = arith.mulf %29, %29 : vector<8x16x32xf32>
    %cst_25 = arith.constant dense<0.000000e+00> : vector<8x16xf32>
    %31 = vector.multi_reduction <add>, %30, %cst_25 [2] : vector<8x16x32xf32> to vector<8x16xf32>
    %32 = vector.shape_cast %31 : vector<8x16xf32> to vector<8x16x1xf32>
    %cst_26 = arith.constant dense<0.000000e+00> : vector<8x1xf32>
    %33 = vector.multi_reduction <add>, %32, %cst_26 [1] : vector<8x16x1xf32> to vector<8x1xf32>
    %34 = vector.shape_cast %33 : vector<8x1xf32> to vector<8x1x1xf32>
    %cst_27 = arith.constant 0.001953125 : f32
    %35 = vector.broadcast %cst_27 : f32 to vector<8x1x1xf32>
    %36 = arith.mulf %34, %35 : vector<8x1x1xf32>
    %cst_28 = arith.constant 9.99999974E-6 : f32
    %37 = vector.broadcast %cst_28 : f32 to vector<8x1x1xf32>
    %38 = arith.addf %36, %37 : vector<8x1x1xf32>
    %39 = math.rsqrt %38 : vector<8x1x1xf32>
    %40 = vector.broadcast %39 : vector<8x1x1xf32> to vector<8x16x32xf32>
    %41 = arith.mulf %29, %40 : vector<8x16x32xf32>
    %c0_29 = arith.constant 0 : index
    %c0_30 = arith.constant 0 : index
    %c0_31 = arith.constant 0 : index
    %42 = vector.load %arg7[%c0_29, %c0_30, %c0_31] : memref<1x16x32xf32, #tpu.memory_space<vmem>>, vector<1x16x32xf32>
    %43 = vector.broadcast %42 : vector<1x16x32xf32> to vector<8x16x32xf32>
    %44 = arith.mulf %41, %43 : vector<8x16x32xf32>
    %c0_32 = arith.constant 0 : index
    %c0_33 = arith.constant 0 : index
    %c0_34 = arith.constant 0 : index
    %45 = vector.load %arg8[%c0_32, %c0_33, %c0_34] : memref<1x16x32xf32, #tpu.memory_space<vmem>>, vector<1x16x32xf32>
    %46 = vector.broadcast %45 : vector<1x16x32xf32> to vector<8x16x32xf32>
    %47 = arith.addf %44, %46 : vector<8x16x32xf32>
    %48 = arith.addf %1, %47 : vector<8x16x32xf32>
    %c0_35 = arith.constant 0 : index
    %c0_36 = arith.constant 0 : index
    %c0_37 = arith.constant 0 : index
    %c0_38 = arith.constant 0 : index
    %49 = vector.load %arg9[%c0_35, %c0_36, %c0_37, %c0_38] : memref<1x8x16x32xf32, #tpu.memory_space<vmem>>, vector<1x8x16x32xf32>
    %50 = vector.shape_cast %49 : vector<1x8x16x32xf32> to vector<8x16x32xf32>
    %51 = vector.shape_cast %48 : vector<8x16x32xf32> to vector<1x8x16x32xf32>
    tpu.vector_store %arg9[%c0_35, %c0_36, %c0_37, %c0_38], %51 {strides = array<i32>} : memref<1x8x16x32xf32, #tpu.memory_space<vmem>>, vector<1x8x16x32xf32>,
    return
  }
  func.func @transform_0(%arg0: i32) -> (i32, i32, i32, i32) {
    %c0_i32 = arith.constant 0 : i32
    %c0_i32_0 = arith.constant 0 : i32
    %c0_i32_1 = arith.constant 0 : i32
    %c0_i32_2 = arith.constant 0 : i32
    return %arg0, %c0_i32, %c0_i32_0, %c0_i32_1 : i32, i32, i32, i32
  }
  func.func @transform_1(%arg0: i32) -> (i32, i32) {
    %c0_i32 = arith.constant 0 : i32
    %c0_i32_0 = arith.constant 0 : i32
    %c0_i32_1 = arith.constant 0 : i32
    return %c0_i32, %c0_i32_0 : i32, i32
  }
  func.func @transform_2(%arg0: i32) -> (i32, i32) {
    %c0_i32 = arith.constant 0 : i32
    %c0_i32_0 = arith.constant 0 : i32
    %c0_i32_1 = arith.constant 0 : i32
    return %c0_i32, %c0_i32_0 : i32, i32
  }
  func.func @transform_3(%arg0: i32) -> (i32, i32) {
    %c0_i32 = arith.constant 0 : i32
    %c0_i32_0 = arith.constant 0 : i32
    %c0_i32_1 = arith.constant 0 : i32
    return %c0_i32, %c0_i32_0 : i32, i32
  }
  func.func @transform_4(%arg0: i32) -> (i32, i32) {
    %c0_i32 = arith.constant 0 : i32
    %c0_i32_0 = arith.constant 0 : i32
    %c0_i32_1 = arith.constant 0 : i32
    return %c0_i32, %c0_i32_0 : i32, i32
  }
  func.func @transform_5(%arg0: i32) -> (i32, i32) {
    %c0_i32 = arith.constant 0 : i32
    %c0_i32_0 = arith.constant 0 : i32
    %c0_i32_1 = arith.constant 0 : i32
    return %c0_i32, %c0_i32_0 : i32, i32
  }
  func.func @transform_6(%arg0: i32) -> (i32, i32, i32) {
    %c0_i32 = arith.constant 0 : i32
    %c0_i32_0 = arith.constant 0 : i32
    %c0_i32_1 = arith.constant 0 : i32
    %c0_i32_2 = arith.constant 0 : i32
    return %c0_i32, %c0_i32_0, %c0_i32_1 : i32, i32, i32
  }
  func.func @transform_7(%arg0: i32) -> (i32, i32, i32) {
    %c0_i32 = arith.constant 0 : i32
    %c0_i32_0 = arith.constant 0 : i32
    %c0_i32_1 = arith.constant 0 : i32
    %c0_i32_2 = arith.constant 0 : i32
    return %c0_i32, %c0_i32_0, %c0_i32_1 : i32, i32, i32
  }
  func.func @transform_8(%arg0: i32) -> (i32, i32, i32, i32) {
    %c0_i32 = arith.constant 0 : i32
    %c0_i32_0 = arith.constant 0 : i32
    %c0_i32_1 = arith.constant 0 : i32
    %c0_i32_2 = arith.constant 0 : i32
    return %arg0, %c0_i32, %c0_i32_0, %c0_i32_1 : i32, i32, i32, i32
  }
}

</mosaic_0001>

<bundles_post_ra>
// kernel: dprnn_forward.3
= control target key start
LH: loop header
LB: loop body
LE: loop exit
PB: predicated region body
PF: predicated region fallthrough
CT: control target
= control target key end

     0   :  { %s1741_s27 = smov 0   ;;  %s2235_s0 = inlined_call_operand.vmem [shape: f32[2,8,16,32], index: 0, kind: input, shape index: {}]   ;;  %s2236_s1 = inlined_call_operand.vmem [shape: f32[32,128], index: 1, kind: input, shape index: {}]   ;;  %s2237_s2 = inlined_call_operand.vmem [shape: f32[32,128], index: 2, kind: input, shape index: {}]   ;;  %s2238_s3 = inlined_call_operand.vmem [shape: f32[1,128], index: 3, kind: input, shape index: {}]   ;;  %s2239_s4 = inlined_call_operand.vmem [shape: f32[32,32], index: 4, kind: input, shape index: {}]   ;;  %s2240_s5 = inlined_call_operand.vmem [shape: f32[1,32], index: 5, kind: input, shape index: {}]   ;;  %s2241_s6 = inlined_call_operand.vmem [shape: f32[1,16,32], index: 6, kind: input, shape index: {}]   ;;  %s2242_s7 = inlined_call_operand.vmem [shape: f32[1,16,32], index: 7, kind: input, shape index: {}]   ;;  %s2243_s8 = inlined_call_operand.vmem [shape: f32[2,8,16,32], index: 8, kind: output, shape index: {}]  }
   0x1 LB: > { %s1359_s28 = sadd.s32 4294967295, %s1672_s27   ;;  %p1363_p0 = scmp.ge.s32.totalorder %s1672_s27, 1  ;;  %s1672_s27 = sphi %s1741_s27, %s18_s27  }
   0x2   : > { %p262_p1 = scmp.lt.s32.totalorder %s1672_s27, 3 }
   0x4   : > { %p263_p2 = pnand %p1363_p0, %p262_p1 }
   0x5   : > { %v322_v0 = vld [vmem:[%s2236_s1] sm:$0xff] (!%p263_p2)  ;;  %v323_v1 = vld [vmem:[%s2236_s1 + $0x8] sm:$0xff] (!%p263_p2)  ;;  %v324_v2 = vld [vmem:[%s2236_s1 + $0x10] sm:$0xff] (!%p263_p2)  ;;  %p296_p3 = scmp.lt.s32.totalorder (!%p263_p2), %s1359_s28, 1  ;;  %vm333_vm0 = vcmask (!%p263_p2), 261120   ;;  %v1874_v59 = vmov (!%p263_p2), 0.0  }
   0x6   : > { %266 = sbr.rel (%p263_p2) target bundleno = 1675 (0x68b), region = 52  ;;  %v1532_v3 = vpack.c.bf16 (!%p263_p2), %v323_v1, %v322_v0  ;;  %v325_v4 = vld [vmem:[%s2236_s1 + $0x18] sm:$0xff] (!%p263_p2)  ;;  %v1854_v22 = vld [vmem:[%s2237_s2] sm:$0xff] (!%p263_p2)  ;;  %v1859_v23 = vld [vmem:[%s2237_s2 + $0x8] sm:$0xff] (!%p263_p2)  ;;  %v1876_v60 = vmov (!%p263_p2), 0.0   ;;  %v1878_v61 = vmov (!%p263_p2), 0.0  }
   0x7   : > { %v1536_v5 = vpack.c.bf16 (!%p263_p2), %v325_v4, %v324_v2  ;;  %v1864_v24 = vld [vmem:[%s2237_s2 + $0x10] sm:$0xff] (!%p263_p2)  ;;  %v1869_v25 = vld [vmem:[%s2237_s2 + $0x18] sm:$0xff] (!%p263_p2)  ;;  %v1368_v26 = vld [vmem:[%s2238_s3] ss:$0 sm:$0xff] (!%p263_p2)  ;;  %v1880_v62 = vmov (!%p263_p2), 0.0   ;;  %s1882_s11 = smov (!%p263_p2), 0  }
   0x8   : > { %1533 = vmatprep.subr.bf16.mxu0 (!%p263_p2), %v1532_v3  ;;  %1556 = vmatprep.subr.bf16.mxu1 (!%p263_p2), %v1532_v3 }
   0x9   : > { %1535 = vmatpush3.bf16.msra.mxu0 (!%p263_p2), %v1532_v3  ;;  %1558 = vmatpush3.bf16.msra.mxu1 (!%p263_p2), %v1532_v3 }
   0xa   : > { %1537 = vmatprep.subr.bf16.mxu0 (!%p263_p2), %v1536_v5  ;;  %1557 = vmatprep.subr.bf16.mxu1 (!%p263_p2), %v1536_v5 }
   0xd   : > { %s2245_s28 = smov (!%p296_p3, %s1359_s28), 1  ;;  %1539 = vmatpush3.bf16.msra.mxu0 %v1536_v5  ;;  %1559 = vmatpush3.bf16.msra.mxu1 %v1536_v5 }
   0xe   : > { %s1409_s15 = sshll.u32 %s2245_s28, 7 }
   0xf   : > { %s1764_s18 = scalar_lea.vmem %s2235_s0, %s1409_s15  ;;  %s1769_s21 = scalar_lea.vmem %s2243_s8, %s1409_s15 }
  0x10   : > { %v1772_v6 = vld [vmem:[%s1764_s18] sm:$0xff]  ;;  %v1782_v8 = vld [vmem:[%s1764_s18 + $0x8] sm:$0xff]  ;;  %v1788_v10 = vld [vmem:[%s1764_s18 + $0x10] sm:$0xff] }
  0x11   : > { %v1775_v7 = vld [vmem:[%s1764_s18 + $0x40] sm:$0xff]  ;;  %1465 = vmatprep.mubr.msk.f32.mxu0 %vm333_vm0, %v1772_v6  ;;  %v1785_v9 = vld [vmem:[%s1764_s18 + $0x48] sm:$0xff]  ;;  %v1791_v11 = vld [vmem:[%s1764_s18 + $0x50] sm:$0xff] }
  0x12   : > { %1477 = vmatprep.mubr.msk.f32.mxu1 %vm333_vm0, %v1775_v7  ;;  %1466 = vmatmul.mubr.msk.f32.vlgmr.msra.gmra.mrb[0].mxu0 %vm333_vm0, %v1782_v8  ;;  %v1802_v12 = vld [vmem:[%s1764_s18 + $0x18] sm:$0xff]  ;;  %v1808_v14 = vld [vmem:[%s1764_s18 + $0x20] sm:$0xff]  ;;  %v1822_v16 = vld [vmem:[%s1764_s18 + $0x28] sm:$0xff] }
  0x13   : > { %1478 = vmatmul.mubr.msk.f32.vlgmr.msra.gmra.mrb[0].mxu1 %vm333_vm0, %v1785_v9  ;;  %1468 = vmatprep.mubr.msk.f32.mxu0 %vm333_vm0, %v1788_v10  ;;  %v1805_v13 = vld [vmem:[%s1764_s18 + $0x58] sm:$0xff]  ;;  %v1811_v15 = vld [vmem:[%s1764_s18 + $0x60] sm:$0xff]  ;;  %v1825_v17 = vld [vmem:[%s1764_s18 + $0x68] sm:$0xff] }
  0x14   : > { %1480 = vmatprep.mubr.msk.f32.mxu1 %vm333_vm0, %v1791_v11  ;;  %v1828_v18 = vld [vmem:[%s1764_s18 + $0x30] sm:$0xff]  ;;  %v1842_v20 = vld [vmem:[%s1764_s18 + $0x38] sm:$0xff] }
  0x15   : > { %v1831_v19 = vld [vmem:[%s1764_s18 + $0x70] sm:$0xff]  ;;  %v1845_v21 = vld [vmem:[%s1764_s18 + $0x78] sm:$0xff] }
  0x16   : > { %1469 = vmatmul.mubr.msk.f32.gmra.mrb[2].mxu0 %vm333_vm0, %v1802_v12 }
  0x17   : > { %1481 = vmatmul.mubr.msk.f32.gmra.mrb[2].mxu1 %vm333_vm0, %v1805_v13  ;;  %1471 = vmatprep.mubr.msk.f32.mxu0 %vm333_vm0, %v1808_v14 }
  0x18   : > { %1483 = vmatprep.mubr.msk.f32.mxu1 %vm333_vm0, %v1811_v15 }
  0x1a   : > { %1472 = vmatmul.mubr.msk.f32.gmra.mrb[4].mxu0 %vm333_vm0, %v1822_v16 }
  0x1b   : > { %1484 = vmatmul.mubr.msk.f32.gmra.mrb[4].mxu1 %vm333_vm0, %v1825_v17  ;;  %1474 = vmatprep.mubr.msk.f32.mxu0 %vm333_vm0, %v1828_v18 }
  0x1c   : > { %1486 = vmatprep.mubr.msk.f32.mxu1 %vm333_vm0, %v1831_v19 }
  0x1e   : > { %1475 = vmatmul.mubr.msk.f32.gmra.mrb[6].mxu0 %vm333_vm0, %v1842_v20 }
  0x1f   : > { %1487 = vmatmul.mubr.msk.f32.gmra.mrb[6].mxu1 %vm333_vm0, %v1845_v21 }
  0xe5   : > { %v1467_v27 = vpop.f32.mrb[0].mxu0 }
  0xe6   : > { %v1479_v28 = vpop.f32.mrb[0].mxu1  ;;  %v454_v29 = vadd.f32 %v1467_v27, %v1368_v26  ;;  %v448_v31 = vpop.f32.mrb[1].mxu0 }
  0xe7   : > { %v494_v30 = vadd.f32 %v1479_v28, %v1368_v26  ;;  %v488_v32 = vpop.f32.mrb[1].mxu1  ;;  %v449_v33 = vadd.f32 %v1368_v26, %v448_v31 }
  0xe8   : > { %v489_v34 = vadd.f32 %v1368_v26, %v488_v32  ;;  %528 = vst [vmem:[#allocation2 + $0x8] sm:$0xff] %v454_v29 }
  0xe9   : > { %536 = vst [vmem:[#allocation2 + $0x48] sm:$0xff] %v494_v30  ;;  %527 = vst [vmem:[#allocation2] sm:$0xff] %v449_v33  ;;  %v1470_v35 = vpop.f32.mrb[2].mxu0 }
  0xea   : > { %535 = vst [vmem:[#allocation2 + $0x40] sm:$0xff] %v489_v34  ;;  %v1482_v36 = vpop.f32.mrb[2].mxu1  ;;  %v464_v37 = vadd.f32 %v1470_v35, %v1368_v26  ;;  %v458_v39 = vpop.f32.mrb[3].mxu0 }
  0xeb   : > { %v504_v38 = vadd.f32 %v1482_v36, %v1368_v26  ;;  %v498_v40 = vpop.f32.mrb[3].mxu1  ;;  %v459_v41 = vadd.f32 %v1368_v26, %v458_v39 }
  0xec   : > { %v499_v42 = vadd.f32 %v1368_v26, %v498_v40  ;;  %530 = vst [vmem:[#allocation2 + $0x18] sm:$0xff] %v464_v37 }
  0xed   : > { %538 = vst [vmem:[#allocation2 + $0x58] sm:$0xff] %v504_v38  ;;  %529 = vst [vmem:[#allocation2 + $0x10] sm:$0xff] %v459_v41  ;;  %v1473_v43 = vpop.f32.mrb[4].mxu0 }
  0xee   : > { %537 = vst [vmem:[#allocation2 + $0x50] sm:$0xff] %v499_v42  ;;  %v1485_v44 = vpop.f32.mrb[4].mxu1  ;;  %v474_v45 = vadd.f32 %v1473_v43, %v1368_v26  ;;  %v468_v47 = vpop.f32.mrb[5].mxu0 }
  0xef   : > { %v514_v46 = vadd.f32 %v1485_v44, %v1368_v26  ;;  %v508_v48 = vpop.f32.mrb[5].mxu1  ;;  %v469_v49 = vadd.f32 %v1368_v26, %v468_v47 }
  0xf0   : > { %v509_v50 = vadd.f32 %v1368_v26, %v508_v48  ;;  %532 = vst [vmem:[#allocation2 + $0x28] sm:$0xff] %v474_v45 }
  0xf1   : > { %540 = vst [vmem:[#allocation2 + $0x68] sm:$0xff] %v514_v46  ;;  %531 = vst [vmem:[#allocation2 + $0x20] sm:$0xff] %v469_v49  ;;  %v1476_v51 = vpop.f32.mrb[6].mxu0 }
  0xf2   : > { %539 = vst [vmem:[#allocation2 + $0x60] sm:$0xff] %v509_v50  ;;  %v1488_v52 = vpop.f32.mrb[6].mxu1  ;;  %v484_v53 = vadd.f32 %v1476_v51, %v1368_v26  ;;  %v478_v55 = vpop.f32.mrb[7].mxu0 }
  0xf3   : > { %v524_v54 = vadd.f32 %v1488_v52, %v1368_v26  ;;  %v518_v56 = vpop.f32.mrb[7].mxu1  ;;  %v479_v57 = vadd.f32 %v1368_v26, %v478_v55 }
  0xf4   : > { %v519_v58 = vadd.f32 %v1368_v26, %v518_v56  ;;  %534 = vst [vmem:[#allocation2 + $0x38] sm:$0xff] %v484_v53 }
  0xf5   : > { %542 = vst [vmem:[#allocation2 + $0x78] sm:$0xff] %v524_v54  ;;  %533 = vst [vmem:[#allocation2 + $0x30] sm:$0xff] %v479_v57 }
  0xf6   : > { %541 = vst [vmem:[#allocation2 + $0x70] sm:$0xff] %v519_v58 }
  0xf7 LB: >> { %v1540_v63 = vpack.c.bf16 %v1859_v23, %v1854_v22  ;;  %v1544_v0 = vpack.c.bf16 %v1869_v25, %v1864_v24  ;;  %s1694_s12 = smov 32   ;;  %s1385_s13 = sshll.u32 %s1692_s11, 4  ;;  %s1692_s11 = sphi %s1882_s11, %s552_s11   ;;  %v1688_v62 = vphi %v1880_v62, %v694_v62   ;;  %v1684_v61 = vphi %v1878_v61, %v695_v61   ;;  %v1680_v60 = vphi %v1876_v60, %v682_v60   ;;  %v1676_v59 = vphi %v1874_v59, %v683_v59  }
  0xf8   : >> { %563 = vrot.lane.b32.xlu0 %v1688_v62, %s1694_s12  ;;  %s558_s14 = scalar_lea.vmem [#allocation2], %s1385_s13  ;;  %s1695_s15 = smov 64  }
  0xf9   : >> { %1541 = vmatprep.subr.bf16.mxu0 %v1540_v63  ;;  %s704_s16 = scalar_lea.vmem [#allocation3], %s1385_s13  ;;  %s552_s11 = sadd.s32 1, %s1692_s11  }
  0xfa   : >> { %1543 = vmatpush3.bf16.msra.mxu0 %v1540_v63  ;;  %p549_p4 = scmp.ge.s32.totalorder %s552_s11, 8  }
  0xfb   : >> { %1545 = vmatprep.subr.bf16.mxu0 %v1544_v0  ;;  %v723_v53 = vld [vmem:[%s2239_s4] sm:$0xff] (%p549_p4)  ;;  %v724_v54 = vld [vmem:[%s2239_s4 + $0x8] sm:$0xff] (%p549_p4)  ;;  %v725_v55 = vld [vmem:[%s2239_s4 + $0x10] sm:$0xff] (%p549_p4) }
  0xfc   : >> { %565 = vrot.lane.b32.xlu0 %v1684_v61, %s1694_s12  ;;  %v1548_v56 = vpack.c.bf16 (%p549_p4), %v724_v54, %v723_v53  ;;  %v726_v57 = vld [vmem:[%s2239_s4 + $0x18] sm:$0xff] (%p549_p4) }
  0xfd   : >> { %v559_v3 = vld [vmem:[%s558_s14] sm:$0xff]  ;;  %v560_v5 = vld [vmem:[%s558_s14 + $0x8] sm:$0xff]  ;;  %v1552_v63 = vpack.c.bf16 (%p549_p4), %v726_v57, %v725_v55 }
  0xfe   : >> { %1547 = vmatpush3.bf16.msra.mxu0 %v1544_v0  ;;  %1560 = vmatprep.subr.bf16.mxu1 (%p549_p4), %v1548_v56 }
  0xff   : > { %1549 = vmatprep.subr.bf16.mxu0 (%p549_p4), %v1548_v56  ;;  %1562 = vmatpush3.bf16.msra.mxu1 (%p549_p4), %v1548_v56 }
 0x100   : > { %1561 = vmatprep.subr.bf16.mxu1 (%p549_p4), %v1552_v63 }
 0x103   : > { %1563 = vmatpush3.bf16.msra.mxu1 (%p549_p4), %v1552_v63 }
 0x16a   : >> { %v564_v1 = vpop.permute.xlu0 %563 }
 0x16b   : >> { %1497 = vmatprep.mubr.msk.f32.mxu0 %vm333_vm0, %v564_v1 }
 0x16e   : >> { %v566_v2 = vpop.permute.xlu0 %565 }
 0x16f   : >> { %1498 = vmatmul.mubr.msk.f32.vlgmr.msra.gmra.mrb[0].mxu0 %vm333_vm0, %v566_v2 }
 0x170   : > { %1551 = vmatpush3.bf16.msra.mxu0 (%p549_p4), %v1548_v56 }
 0x171   : > { %1553 = vmatprep.subr.bf16.mxu0 (%p549_p4), %v1552_v63 }
 0x174   : > { %1555 = vmatpush3.bf16.msra.mxu0 (%p549_p4), %v1552_v63 }
 0x242   : >> { %v1499_v4 = vpop.f32.mrb[0].mxu0 }
 0x243   : >> { %v637_v26 = vpop.f32.mrb[1].mxu0  ;;  %v647_v28 = vadd.f32 %v1499_v4, %v560_v5 }
 0x244   : >> { %v646_v27 = vadd.f32 %v637_v26, %v559_v3 }
 0x245   : >> { %v1389_v32 = vmul.f32 -1.442695, %v647_v28 }
 0x246   : >> { %1614 = vtanh.f32 %v646_v27  ;;  %v1388_v31 = vmul.f32 -1.442695, %v646_v27  ;;  %v1390_v27 = vld [vmem:[%s2240_s5] ss:$0 sm:$0xff] (%p549_p4) }
 0x247   : >> { %1616 = vtanh.f32 %v647_v28 }
 0x248   : >> { %1618 = vpow2.f32 %v1388_v31 }
 0x249   : >> { %1620 = vpow2.f32 %v1389_v32 }
 0x250   : >> { %v1615_v29 = vpop.eup %1614 }
 0x251   : >> { %666 = vrot.lane.b32.xlu1 %v1615_v29, %s1695_s15  ;;  %v1617_v30 = vpop.eup %1616 }
 0x252   : >> { %v1619_v33 = vpop.eup %1618 }
 0x253   : >> { %v654_v34 = vadd.f32 1.0, %v1619_v33  ;;  %v1621_v35 = vpop.eup %1620 }
 0x254   : >> { %v655_v36 = vadd.f32 1.0, %v1621_v35 }
 0x255   : >> { %668 = vrot.lane.b32.xlu1 %v1617_v30, %s1695_s15  ;;  %1622 = vrcp.f32 %v654_v34 }
 0x256   : >> { %1624 = vrcp.f32 %v655_v36 }
 0x25f   : >> { %v1623_v37 = vpop.eup %1622 }
 0x260   : >> { %v1625_v40 = vpop.eup %1624  ;;  %v662_v43 = vmul.f32 %v1680_v60, %v1623_v37 }
 0x261   : >> { %v663_v45 = vmul.f32 %v1676_v59, %v1625_v40 }
 0x2c3   : >> { %v667_v38 = vpop.permute.xlu1 %666 }
 0x2c4   : >> { %v672_v39 = vmul.f32 %v1623_v37, %v667_v38 }
 0x2c6   : >> { %676 = vrot.lane.b32.xlu0 %v672_v39, %s1694_s12 }
 0x2c7   : >> { %v669_v41 = vpop.permute.xlu1 %668 }
 0x2c8   : >> { %v673_v42 = vmul.f32 %v1625_v40, %v669_v41 }
 0x2ca   : >> { %678 = vrot.lane.b32.xlu1 %v673_v42, %s1694_s12 }
 0x338   : >> { %v677_v44 = vpop.permute.xlu0 %676 }
 0x339   : >> { %v682_v60 = vadd.f32 %v677_v44, %v662_v43  }
 0x33b   : >> { %1626 = vtanh.f32 %v682_v60 }
 0x33c   : >> { %v679_v46 = vpop.permute.xlu1 %678 }
 0x33d   : >> { %v683_v59 = vadd.f32 %v679_v46, %v663_v45  }
 0x33f   : >> { %1628 = vtanh.f32 %v683_v59 }
 0x345   : >> { %v1627_v47 = vpop.eup %1626 }
 0x346   : >> { %688 = vrot.lane.b32.xlu0 %v1627_v47, %s1695_s15 }
 0x349   : >> { %v1629_v48 = vpop.eup %1628 }
 0x34a   : >> { %690 = vrot.lane.b32.xlu1 %v1629_v48, %s1695_s15 }
 0x3b8   : >> { %v689_v49 = vpop.permute.xlu0 %688 }
 0x3b9   : >> { %v694_v62 = vmul.f32 %v1623_v37, %v689_v49  }
 0x3bb   : >> { %698 = vrot.lane.b32.xlu0 %v694_v62, %s1694_s12 }
 0x3bc   : >> { %v691_v50 = vpop.permute.xlu1 %690 }
 0x3bd   : >> { %v695_v61 = vmul.f32 %v1625_v40, %v691_v50  }
 0x3bf   : >> { %700 = vrot.lane.b32.xlu1 %v695_v61, %s1694_s12 }
 0x42c   : > { %551 = sbr.rel (!%p549_p4) target bundleno = 247 (0xf7), region = 91 }
 0x42d   : >> { %v699_v51 = vpop.permute.xlu0 %698 }
 0x42e   : >> { %705 = vst.msk [vmem:[%s704_s16] sm:$0xff] %vm333_vm0, %v699_v51 }
 0x431   : >> { %v701_v52 = vpop.permute.xlu1 %700 }
 0x432   : >> { %706 = vst.msk [vmem:[%s704_s16 + $0x8] sm:$0xff] %vm333_vm0, %v701_v52 }
 0x439   : > { %v707_v58 = vld [vmem:[#allocation3] sm:$0xff]  ;;  %v708_v22 = vld [vmem:[#allocation3 + $0x8] sm:$0xff]  ;;  %v709_v24 = vld [vmem:[#allocation3 + $0x10] sm:$0xff] }
 0x43a   : > { %v715_v62 = vld [vmem:[#allocation3 + $0x40] sm:$0xff]  ;;  %1508 = vmatprep.mubr.msk.f32.mxu0 %vm333_vm0, %v707_v58  ;;  %v716_v23 = vld [vmem:[#allocation3 + $0x48] sm:$0xff]  ;;  %v717_v25 = vld [vmem:[#allocation3 + $0x50] sm:$0xff] }
 0x43b   : > { %1520 = vmatprep.mubr.msk.f32.mxu1 %vm333_vm0, %v715_v62  ;;  %1509 = vmatmul.mubr.msk.f32.vlgmr.msra.gmra.mrb[0].mxu0 %vm333_vm0, %v708_v22  ;;  %v710_v59 = vld [vmem:[#allocation3 + $0x18] sm:$0xff]  ;;  %v711_v61 = vld [vmem:[#allocation3 + $0x20] sm:$0xff]  ;;  %v712_v1 = vld [vmem:[#allocation3 + $0x28] sm:$0xff] }
 0x43c   : > { %1521 = vmatmul.mubr.msk.f32.vlgmr.msra.gmra.mrb[0].mxu1 %vm333_vm0, %v716_v23  ;;  %1511 = vmatprep.mubr.msk.f32.mxu0 %vm333_vm0, %v709_v24  ;;  %v718_v60 = vld [vmem:[#allocation3 + $0x58] sm:$0xff]  ;;  %v719_v0 = vld [vmem:[#allocation3 + $0x60] sm:$0xff]  ;;  %v720_v2 = vld [vmem:[#allocation3 + $0x68] sm:$0xff] }
 0x43d   : > { %1523 = vmatprep.mubr.msk.f32.mxu1 %vm333_vm0, %v717_v25  ;;  %v713_v3 = vld [vmem:[#allocation3 + $0x30] sm:$0xff]  ;;  %v714_v5 = vld [vmem:[#allocation3 + $0x38] sm:$0xff] }
 0x43e   : > { %v721_v4 = vld [vmem:[#allocation3 + $0x70] sm:$0xff]  ;;  %v722_v26 = vld [vmem:[#allocation3 + $0x78] sm:$0xff] }
 0x43f   : > { %1512 = vmatmul.mubr.msk.f32.gmra.mrb[2].mxu0 %vm333_vm0, %v710_v59 }
 0x440   : > { %1524 = vmatmul.mubr.msk.f32.gmra.mrb[2].mxu1 %vm333_vm0, %v718_v60  ;;  %1514 = vmatprep.mubr.msk.f32.mxu0 %vm333_vm0, %v711_v61 }
 0x441   : > { %1526 = vmatprep.mubr.msk.f32.mxu1 %vm333_vm0, %v719_v0 }
 0x443   : > { %1515 = vmatmul.mubr.msk.f32.gmra.mrb[4].mxu0 %vm333_vm0, %v712_v1 }
 0x444   : > { %1527 = vmatmul.mubr.msk.f32.gmra.mrb[4].mxu1 %vm333_vm0, %v720_v2  ;;  %1517 = vmatprep.mubr.msk.f32.mxu0 %vm333_vm0, %v713_v3 }
 0x445   : > { %1529 = vmatprep.mubr.msk.f32.mxu1 %vm333_vm0, %v721_v4 }
 0x447   : > { %1518 = vmatmul.mubr.msk.f32.gmra.mrb[6].mxu0 %vm333_vm0, %v714_v5 }
 0x448   : > { %1530 = vmatmul.mubr.msk.f32.gmra.mrb[6].mxu1 %vm333_vm0, %v722_v26 }
 0x50e   : > { %v1510_v28 = vpop.f32.mrb[0].mxu0 }
 0x50f   : > { %v1522_v29 = vpop.f32.mrb[0].mxu1  ;;  %v1956_v30 = vadd.f32 %v1510_v28, %v1390_v27  ;;  %v848_v32 = vpop.f32.mrb[1].mxu0 }
 0x510   : > { %v1958_v31 = vadd.f32 %v1522_v29, %v1390_v27  ;;  %v888_v33 = vpop.f32.mrb[1].mxu1  ;;  %v1960_v34 = vadd.f32 %v1390_v27, %v848_v32 }
 0x511   : > { %v930_v36 = vsel %vm333_vm0, %v1956_v30, 0.0  ;;  %v1970_v43 = vadd.f32 %v1390_v27, %v888_v33 }
 0x512   : > { %v954_v35 = vsel %vm333_vm0, %v1958_v31, 0.0  ;;  %931 = vadd.xlane.f32.xlu0 %v930_v36  ;;  %v1513_v37 = vpop.f32.mrb[2].mxu0  ;;  %v927_v45 = vsel %vm333_vm0, %v1960_v34, 0.0 }
 0x513   : > { %955 = vadd.xlane.f32.xlu1 %v954_v35  ;;  %v1525_v38 = vpop.f32.mrb[2].mxu1  ;;  %v1966_v39 = vadd.f32 %v1513_v37, %v1390_v27  ;;  %v858_v40 = vpop.f32.mrb[3].mxu0  ;;  %v951_v53 = vsel %vm333_vm0, %v1970_v43, 0.0 }
 0x514   : > { %v1968_v41 = vadd.f32 %v1525_v38, %v1390_v27  ;;  %v898_v42 = vpop.f32.mrb[3].mxu1  ;;  %v1978_v51 = vadd.f32 %v1390_v27, %v858_v40 }
 0x515   : > { %v936_v44 = vsel %vm333_vm0, %v1966_v39, 0.0  ;;  %v1980_v52 = vadd.f32 %v1390_v27, %v898_v42 }
 0x516   : > { %928 = vadd.xlane.f32.xlu0 %v927_v45  ;;  %v1516_v46 = vpop.f32.mrb[4].mxu0  ;;  %v960_v48 = vsel %vm333_vm0, %v1968_v41, 0.0  ;;  %v933_v63 = vsel %vm333_vm0, %v1978_v51, 0.0 }
 0x517   : > { %937 = vadd.xlane.f32.xlu1 %v936_v44  ;;  %v1528_v47 = vpop.f32.mrb[4].mxu1  ;;  %v868_v49 = vpop.f32.mrb[5].mxu0  ;;  %v1984_v56 = vadd.f32 %v1516_v46, %v1390_v27  ;;  %v957_v22 = vsel %vm333_vm0, %v1980_v52, 0.0 }
 0x518   : > { %v908_v50 = vpop.f32.mrb[5].mxu1  ;;  %v1986_v57 = vadd.f32 %v1390_v27, %v868_v49  ;;  %v1992_v23 = vadd.f32 %v1528_v47, %v1390_v27 }
 0x519   : > { %v1994_v24 = vadd.f32 %v1390_v27, %v908_v50  ;;  %v942_v25 = vsel %vm333_vm0, %v1984_v56, 0.0 }
 0x51a   : > { %952 = vadd.xlane.f32.xlu0 %v951_v53  ;;  %v1519_v54 = vpop.f32.mrb[6].mxu0  ;;  %v939_v59 = vsel %vm333_vm0, %v1986_v57, 0.0  ;;  %v966_v0 = vsel %vm333_vm0, %v1992_v23, 0.0 }
 0x51b   : > { %961 = vadd.xlane.f32.xlu1 %v960_v48  ;;  %v1531_v55 = vpop.f32.mrb[6].mxu1  ;;  %v878_v58 = vpop.f32.mrb[7].mxu0  ;;  %v2000_v60 = vadd.f32 %v1519_v54, %v1390_v27  ;;  %v963_v1 = vsel %vm333_vm0, %v1994_v24, 0.0 }
 0x51c   : > { %v918_v62 = vpop.f32.mrb[7].mxu1  ;;  %v2002_v61 = vadd.f32 %v1390_v27, %v878_v58  ;;  %v2008_v2 = vadd.f32 %v1531_v55, %v1390_v27 }
 0x51d   : > { %v2010_v3 = vadd.f32 %v1390_v27, %v918_v62  ;;  %v948_v4 = vsel %vm333_vm0, %v2000_v60, 0.0 }
 0x51e   : > { %958 = vadd.xlane.f32.xlu0 %v957_v22  ;;  %v945_v5 = vsel %vm333_vm0, %v2002_v61, 0.0  ;;  %v972_v26 = vsel %vm333_vm0, %v2008_v2, 0.0 }
 0x51f   : > { %934 = vadd.xlane.f32.xlu1 %v933_v63  ;;  %v969_v28 = vsel %vm333_vm0, %v2010_v3, 0.0 }
 0x522   : > { %940 = vadd.xlane.f32.xlu0 %v939_v59 }
 0x523   : > { %943 = vadd.xlane.f32.xlu1 %v942_v25 }
 0x526   : > { %964 = vadd.xlane.f32.xlu0 %v963_v1 }
 0x527   : > { %967 = vadd.xlane.f32.xlu1 %v966_v0 }
 0x52a   : > { %946 = vadd.xlane.f32.xlu0 %v945_v5 }
 0x52b   : > { %949 = vadd.xlane.f32.xlu1 %v948_v4 }
 0x52e   : > { %970 = vadd.xlane.f32.xlu0 %v969_v28 }
 0x52f   : > { %973 = vadd.xlane.f32.xlu1 %v972_v26 }
 0x59f   : > { %v932_v32 = vpop.xlane.xlu0 %931 }
 0x5a0   : > { %v956_v29 = vpop.xlane.xlu1 %955 }
 0x5a3   : > { %v929_v33 = vpop.xlane.xlu0 %928 }
 0x5a4   : > { %v938_v27 = vpop.xlane.xlu1 %937  ;;  %v975_v35 = vadd.f32 %v932_v32, %v929_v33 }
 0x5a6   : > { %v976_v36 = vrot.slane %v975_v35, 4 }
 0x5a7   : > { %v953_v38 = vpop.xlane.xlu0 %952 }
 0x5a8   : > { %v962_v37 = vpop.xlane.xlu1 %961  ;;  %v977_v40 = vadd.f32 %v976_v36, %v975_v35  ;;  %v1003_v42 = vadd.f32 %v956_v29, %v953_v38 }
 0x5aa   : > { %v978_v44 = vrot.slane %v977_v40, 2  ;;  %v1004_v45 = vrot.slane %v1003_v42, 4 }
 0x5ab   : > { %v959_v47 = vpop.xlane.xlu0 %958 }
 0x5ac   : > { %v935_v46 = vpop.xlane.xlu1 %934  ;;  %v979_v48 = vadd.f32 %v978_v44, %v977_v40  ;;  %v1005_v49 = vadd.f32 %v1004_v45, %v1003_v42  ;;  %v1010_v53 = vadd.f32 %v962_v37, %v959_v47 }
 0x5ad   : > { %v982_v50 = vadd.f32 %v938_v27, %v935_v46 }
 0x5ae   : > { %v980_v54 = vrot.slane %v979_v48, 1  ;;  %v1006_v55 = vrot.slane %v1005_v49, 2  ;;  %v1011_v62 = vrot.slane %v1010_v53, 4 }
 0x5af   : > { %v983_v58 = vrot.slane %v982_v50, 4  ;;  %v941_v22 = vpop.xlane.xlu0 %940 }
 0x5b0   : > { %v944_v63 = vpop.xlane.xlu1 %943  ;;  %v1007_v25 = vadd.f32 %v1006_v55, %v1005_v49  ;;  %v1012_v0 = vadd.f32 %v1011_v62, %v1010_v53  ;;  %v981_v4 = vadd.f32 %v980_v54, %v979_v48 }
 0x5b1   : > { %v984_v59 = vadd.f32 %v983_v58, %v982_v50  ;;  %v989_v1 = vadd.f32 %v944_v63, %v941_v22 }
 0x5b2   : > { %v1008_v5 = vrot.slane %v1007_v25, 1  ;;  %v1013_v28 = vrot.slane %v1012_v0, 2  ;;  %v1031_v35 = vmul.f32 0.001953125, %v981_v4 }
 0x5b3   : > { %v985_v26 = vrot.slane %v984_v59, 2  ;;  %v990_v29 = vrot.slane %v989_v1, 4  ;;  %v965_v33 = vpop.xlane.xlu0 %964 }
 0x5b4   : > { %v968_v32 = vpop.xlane.xlu1 %967  ;;  %v1014_v36 = vadd.f32 %v1013_v28, %v1012_v0  ;;  %v2021_v40 = vsub.f32 %v1956_v30, %v1031_v35  ;;  %v2024_v42 = vsub.f32 %v1960_v34, %v1031_v35  ;;  %v1009_v44 = vadd.f32 %v1008_v5, %v1007_v25 }
 0x5b5   : > { %v986_v27 = vadd.f32 %v985_v26, %v984_v59  ;;  %v991_v37 = vadd.f32 %v990_v29, %v989_v1  ;;  %v1017_v38 = vadd.f32 %v968_v32, %v965_v33 }
 0x5b6   : > { %v1015_v48 = vrot.slane %v1014_v36, 1  ;;  %v1056_v53 = vmul.f32 %v2021_v40, %v2021_v40  ;;  %v1055_v54 = vmul.f32 %v2024_v42, %v2024_v42  ;;  %v1035_v55 = vmul.f32 0.001953125, %v1009_v44 }
 0x5b7   : > { %v987_v45 = vrot.slane %v986_v27, 1  ;;  %v992_v46 = vrot.slane %v991_v37, 2  ;;  %v1018_v47 = vrot.slane %v1017_v38, 4  ;;  %v947_v50 = vpop.xlane.xlu0 %946 }
 0x5b8   : > { %v950_v49 = vpop.xlane.xlu1 %949  ;;  %v1074_v34 = vsel %vm333_vm0, %v1056_v53, 0.0  ;;  %v1071_v22 = vsel %vm333_vm0, %v1055_v54, 0.0  ;;  %v2033_v25 = vsub.f32 %v1958_v31, %v1035_v55  ;;  %v2036_v59 = vsub.f32 %v1970_v43, %v1035_v55 }
 0x5b9   : > { %v993_v58 = vadd.f32 %v992_v46, %v991_v37  ;;  %v1019_v30 = vadd.f32 %v1018_v47, %v1017_v38  ;;  %v996_v62 = vadd.f32 %v950_v49, %v947_v50  ;;  %v988_v63 = vadd.f32 %v987_v45, %v986_v27  ;;  %1075 = vadd.xlane.f32.xlu1 %v1074_v34 }
 0x5ba   : > { %1072 = vadd.xlane.f32.xlu0 %v1071_v22  ;;  %v1064_v29 = vmul.f32 %v2033_v25, %v2033_v25  ;;  %v1063_v32 = vmul.f32 %v2036_v59, %v2036_v59  ;;  %v1016_v33 = vadd.f32 %v1015_v48, %v1014_v36 }
 0x5bb   : > { %v1020_v0 = vrot.slane %v1019_v30, 2  ;;  %v997_v1 = vrot.slane %v996_v62, 4  ;;  %v1032_v4 = vmul.f32 0.001953125, %v988_v63  ;;  %v994_v5 = vrot.slane %v993_v58, 1  ;;  %v971_v28 = vpop.xlane.xlu0 %970 }
 0x5bc   : > { %v974_v26 = vpop.xlane.xlu1 %973  ;;  %v1098_v37 = vsel %vm333_vm0, %v1064_v29, 0.0  ;;  %v1095_v38 = vsel %vm333_vm0, %v1063_v32, 0.0  ;;  %v1036_v45 = vmul.f32 0.001953125, %v1016_v33 }
 0x5bd   : > { %v1021_v31 = vadd.f32 %v1020_v0, %v1019_v30  ;;  %v998_v35 = vadd.f32 %v997_v1, %v996_v62  ;;  %v1024_v27 = vadd.f32 %v974_v26, %v971_v28  ;;  %v2043_v43 = vsub.f32 %v1966_v39, %v1032_v4  ;;  %1099 = vadd.xlane.f32.xlu1 %v1098_v37 }
 0x5be   : > { %v2048_v44 = vsub.f32 %v1978_v51, %v1032_v4  ;;  %1096 = vadd.xlane.f32.xlu0 %v1095_v38  ;;  %v2055_v48 = vsub.f32 %v1968_v41, %v1036_v45  ;;  %v2058_v50 = vsub.f32 %v1980_v52, %v1036_v45  ;;  %v995_v51 = vadd.f32 %v994_v5, %v993_v58 }
 0x5bf   : > { %v1022_v46 = vrot.slane %v1021_v31, 1  ;;  %v999_v47 = vrot.slane %v998_v35, 2  ;;  %v1025_v49 = vrot.slane %v1024_v27, 4  ;;  %v1058_v36 = vmul.f32 %v2043_v43, %v2043_v43 }
 0x5c0   : > { %v1057_v39 = vmul.f32 %v2048_v44, %v2048_v44  ;;  %v1066_v63 = vmul.f32 %v2055_v48, %v2055_v48  ;;  %v1065_v34 = vmul.f32 %v2058_v50, %v2058_v50  ;;  %v1033_v22 = vmul.f32 0.001953125, %v995_v51 }
 0x5c1   : > { %v1000_v53 = vadd.f32 %v999_v47, %v998_v35  ;;  %v1026_v54 = vadd.f32 %v1025_v49, %v1024_v27  ;;  %v1080_v55 = vsel %vm333_vm0, %v1058_v36, 0.0  ;;  %v1023_v30 = vadd.f32 %v1022_v46, %v1021_v31 }
 0x5c2   : > { %v1077_v62 = vsel %vm333_vm0, %v1057_v39, 0.0  ;;  %1081 = vadd.xlane.f32.xlu1 %v1080_v55  ;;  %v2067_v58 = vsub.f32 %v1984_v56, %v1033_v22  ;;  %v2070_v1 = vsub.f32 %v1986_v57, %v1033_v22  ;;  %v1104_v29 = vsel %vm333_vm0, %v1066_v63, 0.0 }
 0x5c3   : > { %v1001_v41 = vrot.slane %v1000_v53, 1  ;;  %v1027_v0 = vrot.slane %v1026_v54, 2  ;;  %1078 = vadd.xlane.f32.xlu0 %v1077_v62  ;;  %v1037_v52 = vmul.f32 0.001953125, %v1023_v30  ;;  %v1101_v32 = vsel %vm333_vm0, %v1065_v34, 0.0 }
 0x5c4   : > { %v1060_v33 = vmul.f32 %v2067_v58, %v2067_v58  ;;  %v1059_v56 = vmul.f32 %v2070_v1, %v2070_v1 }
 0x5c5   : > { %v1028_v4 = vadd.f32 %v1027_v0, %v1026_v54  ;;  %v2073_v5 = vsub.f32 %v1992_v23, %v1037_v52  ;;  %v2076_v26 = vsub.f32 %v1994_v24, %v1037_v52  ;;  %v1002_v28 = vadd.f32 %v1001_v41, %v1000_v53 }
 0x5c6   : > { %1105 = vadd.xlane.f32.xlu1 %v1104_v29  ;;  %v1086_v23 = vsel %vm333_vm0, %v1060_v33, 0.0  ;;  %v1083_v27 = vsel %vm333_vm0, %v1059_v56, 0.0 }
 0x5c7   : > { %v1029_v57 = vrot.slane %v1028_v4, 1  ;;  %1102 = vadd.xlane.f32.xlu0 %v1101_v32  ;;  %v1034_v31 = vmul.f32 0.001953125, %v1002_v28  ;;  %v1068_v24 = vmul.f32 %v2073_v5, %v2073_v5  ;;  %v1067_v35 = vmul.f32 %v2076_v26, %v2076_v26 }
 0x5c9   : > { %v2091_v37 = vsub.f32 %v2000_v60, %v1034_v31  ;;  %v2094_v38 = vsub.f32 %v2002_v61, %v1034_v31  ;;  %v1030_v45 = vadd.f32 %v1029_v57, %v1028_v4  ;;  %v1110_v47 = vsel %vm333_vm0, %v1068_v24, 0.0 }
 0x5ca   : > { %1087 = vadd.xlane.f32.xlu1 %v1086_v23  ;;  %v1107_v49 = vsel %vm333_vm0, %v1067_v35, 0.0 }
 0x5cb   : > { %1084 = vadd.xlane.f32.xlu0 %v1083_v27  ;;  %v1038_v46 = vmul.f32 0.001953125, %v1030_v45  ;;  %v1062_v36 = vmul.f32 %v2091_v37, %v2091_v37  ;;  %v1061_v39 = vmul.f32 %v2094_v38, %v2094_v38 }
 0x5cd   : > { %v2103_v60 = vsub.f32 %v2008_v2, %v1038_v46  ;;  %v2106_v61 = vsub.f32 %v2010_v3, %v1038_v46  ;;  %v1092_v51 = vsel %vm333_vm0, %v1062_v36, 0.0  ;;  %v1089_v53 = vsel %vm333_vm0, %v1061_v39, 0.0 }
 0x5ce   : > { %1111 = vadd.xlane.f32.xlu1 %v1110_v47 }
 0x5cf   : > { %1108 = vadd.xlane.f32.xlu0 %v1107_v49  ;;  %v1070_v54 = vmul.f32 %v2103_v60, %v2103_v60  ;;  %v1069_v55 = vmul.f32 %v2106_v61, %v2106_v61 }
 0x5d1   : > { %v1116_v2 = vsel %vm333_vm0, %v1070_v54, 0.0  ;;  %v1113_v30 = vsel %vm333_vm0, %v1069_v55, 0.0 }
 0x5d2   : > { %1093 = vadd.xlane.f32.xlu1 %v1092_v51 }
 0x5d3   : > { %1090 = vadd.xlane.f32.xlu0 %v1089_v53 }
 0x5d6   : > { %1117 = vadd.xlane.f32.xlu1 %v1116_v2 }
 0x5d7   : > { %1114 = vadd.xlane.f32.xlu0 %v1113_v30 }
 0x646   : > { %v1076_v3 = vpop.xlane.xlu1 %1075 }
 0x647   : > { %v1073_v62 = vpop.xlane.xlu0 %1072 }
 0x648   : > { %v1119_v63 = vadd.f32 %v1076_v3, %v1073_v62 }
 0x64a   : > { %v1120_v34 = vrot.slane %v1119_v63, 4  ;;  %v1100_v22 = vpop.xlane.xlu1 %1099 }
 0x64b   : > { %v1097_v41 = vpop.xlane.xlu0 %1096 }
 0x64c   : > { %v1121_v0 = vadd.f32 %v1120_v34, %v1119_v63  ;;  %v1147_v52 = vadd.f32 %v1100_v22, %v1097_v41 }
 0x64e   : > { %v1122_v4 = vrot.slane %v1121_v0, 2  ;;  %v1148_v28 = vrot.slane %v1147_v52, 4 }
 0x64f   : > { %v1082_v29 = vpop.xlane.xlu1 %1081 }
 0x650   : > { %v1079_v32 = vpop.xlane.xlu0 %1078  ;;  %v1123_v33 = vadd.f32 %v1122_v4, %v1121_v0  ;;  %v1149_v56 = vadd.f32 %v1148_v28, %v1147_v52 }
 0x651   : > { %v1126_v57 = vadd.f32 %v1082_v29, %v1079_v32 }
 0x652   : > { %v1124_v31 = vrot.slane %v1123_v33, 1  ;;  %v1150_v23 = vrot.slane %v1149_v56, 2 }
 0x653   : > { %v1127_v24 = vrot.slane %v1126_v57, 4  ;;  %v1106_v35 = vpop.xlane.xlu1 %1105 }
 0x654   : > { %v1103_v27 = vpop.xlane.xlu0 %1102  ;;  %v1125_v45 = vadd.f32 %v1124_v31, %v1123_v33  ;;  %v1151_v46 = vadd.f32 %v1150_v23, %v1149_v56 }
 0x655   : > { %v1128_v47 = vadd.f32 %v1127_v24, %v1126_v57  ;;  %v1154_v49 = vadd.f32 %v1106_v35, %v1103_v27 }
 0x656   : > { %v1175_v36 = vmul.f32 0.001953125, %v1125_v45  ;;  %v1152_v39 = vrot.slane %v1151_v46, 1 }
 0x657   : > { %v1129_v51 = vrot.slane %v1128_v47, 2  ;;  %v1155_v53 = vrot.slane %v1154_v49, 4  ;;  %v1088_v54 = vpop.xlane.xlu1 %1087 }
 0x658   : > { %v1085_v55 = vpop.xlane.xlu0 %1084  ;;  %v1183_v2 = vadd.f32 1e-05, %v1175_v36  ;;  %v1153_v30 = vadd.f32 %v1152_v39, %v1151_v46 }
 0x659   : > { %v1130_v3 = vadd.f32 %v1129_v51, %v1128_v47  ;;  %v1156_v62 = vadd.f32 %v1155_v53, %v1154_v49  ;;  %v1133_v63 = vadd.f32 %v1088_v54, %v1085_v55 }
 0x65a   : > { %1630 = vrsqrt.f32 %v1183_v2  ;;  %v1179_v34 = vmul.f32 0.001953125, %v1153_v30 }
 0x65b   : > { %v1131_v22 = vrot.slane %v1130_v3, 1  ;;  %v1157_v41 = vrot.slane %v1156_v62, 2  ;;  %v1134_v0 = vrot.slane %v1133_v63, 4  ;;  %v1112_v52 = vpop.xlane.xlu1 %1111 }
 0x65c   : > { %v1109_v4 = vpop.xlane.xlu0 %1108  ;;  %v1187_v28 = vadd.f32 1e-05, %v1179_v34 }
 0x65d   : > { %v1132_v29 = vadd.f32 %v1131_v22, %v1130_v3  ;;  %v1158_v32 = vadd.f32 %v1157_v41, %v1156_v62  ;;  %v1161_v33 = vadd.f32 %v1112_v52, %v1109_v4  ;;  %v1135_v56 = vadd.f32 %v1134_v0, %v1133_v63  ;;  %v2119_v3 = vld [vmem:[%s2241_s6] sm:$0xff]  ;;  %v2124_v62 = vld [vmem:[%s2241_s6 + $0x8] sm:$0xff] }
 0x65e   : > { %1632 = vrsqrt.f32 %v1187_v28  ;;  %v2131_v28 = vld [vmem:[%s2242_s7] sm:$0xff] }
 0x65f   : > { %v1176_v57 = vmul.f32 0.001953125, %v1132_v29  ;;  %v1159_v31 = vrot.slane %v1158_v32, 1  ;;  %v1162_v23 = vrot.slane %v1161_v33, 4  ;;  %v1136_v24 = vrot.slane %v1135_v56, 2  ;;  %v1094_v35 = vpop.xlane.xlu1 %1093  ;;  %v2136_v29 = vld [vmem:[%s2242_s7 + $0x8] sm:$0xff] }
 0x660   : > { %v1091_v27 = vpop.xlane.xlu0 %1090 }
 0x661   : > { %v1184_v45 = vadd.f32 1e-05, %v1176_v57  ;;  %v1160_v46 = vadd.f32 %v1159_v31, %v1158_v32  ;;  %v1163_v47 = vadd.f32 %v1162_v23, %v1161_v33  ;;  %v1140_v49 = vadd.f32 %v1094_v35, %v1091_v27 }
 0x662   : > { %v1137_v36 = vadd.f32 %v1136_v24, %v1135_v56 }
 0x663   : > { %1634 = vrsqrt.f32 %v1184_v45  ;;  %v1180_v39 = vmul.f32 0.001953125, %v1160_v46  ;;  %v1164_v51 = vrot.slane %v1163_v47, 2  ;;  %v1141_v53 = vrot.slane %v1140_v49, 4  ;;  %v1118_v55 = vpop.xlane.xlu1 %1117 }
 0x664   : > { %v1138_v54 = vrot.slane %v1137_v36, 1  ;;  %v1115_v2 = vpop.xlane.xlu0 %1114  ;;  %v1631_v30 = vpop.eup %1630 }
 0x665   : > { %v1188_v63 = vadd.f32 1e-05, %v1180_v39  ;;  %v1165_v34 = vadd.f32 %v1164_v51, %v1163_v47  ;;  %v1142_v22 = vadd.f32 %v1141_v53, %v1140_v49  ;;  %v1168_v41 = vadd.f32 %v1118_v55, %v1115_v2 }
 0x666   : > { %v1199_v0 = vmul.f32 %v1631_v30, %v2024_v42  ;;  %v1200_v52 = vmul.f32 %v1631_v30, %v2021_v40  ;;  %v1139_v4 = vadd.f32 %v1138_v54, %v1137_v36 }
 0x667   : > { %1636 = vrsqrt.f32 %v1188_v63  ;;  %v1166_v32 = vrot.slane %v1165_v34, 1  ;;  %v1143_v33 = vrot.slane %v1142_v22, 2  ;;  %v1169_v56 = vrot.slane %v1168_v41, 4 }
 0x668   : > { %v1217_v57 = vmul.f32 %v2119_v3, %v1199_v0  ;;  %v1218_v42 = vmul.f32 %v2124_v62, %v1200_v52  ;;  %v1177_v40 = vmul.f32 0.001953125, %v1139_v4  ;;  %v1633_v31 = vpop.eup %1632 }
 0x669   : > { %v1167_v23 = vadd.f32 %v1166_v32, %v1165_v34  ;;  %v1144_v24 = vadd.f32 %v1143_v33, %v1142_v22  ;;  %v1170_v35 = vadd.f32 %v1169_v56, %v1168_v41  ;;  %v1207_v46 = vmul.f32 %v1633_v31, %v2036_v59 }
 0x66a   : > { %v1235_v27 = vadd.f32 %v2131_v28, %v1217_v57  ;;  %v1236_v45 = vadd.f32 %v2136_v29, %v1218_v42  ;;  %v1208_v47 = vmul.f32 %v1633_v31, %v2033_v25  ;;  %v1185_v49 = vadd.f32 1e-05, %v1177_v40 }
 0x66b   : > { %v1181_v36 = vmul.f32 0.001953125, %v1167_v23  ;;  %v1145_v39 = vrot.slane %v1144_v24, 1  ;;  %v1171_v51 = vrot.slane %v1170_v35, 2  ;;  %v1225_v55 = vmul.f32 %v2119_v3, %v1207_v46 }
 0x66c   : > { %v1251_v53 = vadd.f32 %v1235_v27, %v1772_v6  ;;  %v1252_v54 = vadd.f32 %v1236_v45, %v1782_v8  ;;  %v1226_v2 = vmul.f32 %v2124_v62, %v1208_v47  ;;  %1638 = vrsqrt.f32 %v1185_v49 }
 0x66d   : > { %v1635_v30 = vpop.eup %1634  ;;  %v1189_v63 = vadd.f32 1e-05, %v1181_v36  ;;  %v1146_v34 = vadd.f32 %v1145_v39, %v1144_v24  ;;  %v1172_v59 = vadd.f32 %v1171_v51, %v1170_v35  ;;  %v1243_v25 = vadd.f32 %v2131_v28, %v1225_v55 }
 0x66e   : > { %1267 = vst.msk [vmem:[%s1769_s21] sm:$0xff] %vm333_vm0, %v1251_v53  ;;  %1268 = vst.msk [vmem:[%s1769_s21 + $0x8] sm:$0xff] %vm333_vm0, %v1252_v54  ;;  %v1244_v6 = vadd.f32 %v2136_v29, %v1226_v2  ;;  %v1201_v8 = vmul.f32 %v1635_v30, %v2048_v44  ;;  %v1202_v22 = vmul.f32 %v1635_v30, %v2043_v43 }
 0x66f   : > { %1640 = vrsqrt.f32 %v1189_v63  ;;  %v1178_v41 = vmul.f32 0.001953125, %v1146_v34  ;;  %v1173_v0 = vrot.slane %v1172_v59, 1  ;;  %v1259_v52 = vadd.f32 %v1243_v25, %v1775_v7 }
 0x670   : > { %v1260_v4 = vadd.f32 %v1244_v6, %v1785_v9  ;;  %v1219_v32 = vmul.f32 %v2119_v3, %v1201_v8  ;;  %v1220_v33 = vmul.f32 %v2124_v62, %v1202_v22 }
 0x671   : > { %v1637_v56 = vpop.eup %1636  ;;  %v1186_v57 = vadd.f32 1e-05, %v1178_v41  ;;  %v1174_v42 = vadd.f32 %v1173_v0, %v1172_v59  ;;  %1275 = vst.msk [vmem:[%s1769_s21 + $0x40] sm:$0xff] %vm333_vm0, %v1259_v52 }
 0x672   : > { %1276 = vst.msk [vmem:[%s1769_s21 + $0x48] sm:$0xff] %vm333_vm0, %v1260_v4  ;;  %v1237_v43 = vadd.f32 %v2131_v28, %v1219_v32  ;;  %v1238_v44 = vadd.f32 %v2136_v29, %v1220_v33  ;;  %v1209_v7 = vmul.f32 %v1637_v56, %v2058_v50  ;;  %v1210_v9 = vmul.f32 %v1637_v56, %v2055_v48 }
 0x673   : > { %1642 = vrsqrt.f32 %v1186_v57  ;;  %v1182_v40 = vmul.f32 0.001953125, %v1174_v42 }
 0x674   : > { %v1253_v31 = vadd.f32 %v1237_v43, %v1788_v10  ;;  %v1254_v23 = vadd.f32 %v1238_v44, %v1802_v12  ;;  %v1227_v24 = vmul.f32 %v2119_v3, %v1209_v7  ;;  %v1228_v35 = vmul.f32 %v2124_v62, %v1210_v9 }
 0x675   : > { %v1190_v27 = vadd.f32 1e-05, %v1182_v40 }
 0x676   : > { %1269 = vst.msk [vmem:[%s1769_s21 + $0x10] sm:$0xff] %vm333_vm0, %v1253_v31  ;;  %1270 = vst.msk [vmem:[%s1769_s21 + $0x18] sm:$0xff] %vm333_vm0, %v1254_v23  ;;  %v1245_v50 = vadd.f32 %v2131_v28, %v1227_v24  ;;  %v1246_v48 = vadd.f32 %v2136_v29, %v1228_v35  ;;  %v1639_v45 = vpop.eup %1638 }
 0x677   : > { %1644 = vrsqrt.f32 %v1190_v27  ;;  %v1203_v46 = vmul.f32 %v1639_v45, %v2070_v1  ;;  %v1204_v47 = vmul.f32 %v1639_v45, %v2067_v58 }
 0x678   : > { %v1261_v10 = vadd.f32 %v1245_v50, %v1791_v11  ;;  %v1262_v12 = vadd.f32 %v1246_v48, %v1805_v13 }
 0x679   : > { %v1641_v49 = vpop.eup %1640  ;;  %v1221_v36 = vmul.f32 %v2119_v3, %v1203_v46  ;;  %v1222_v39 = vmul.f32 %v2124_v62, %v1204_v47 }
 0x67a   : > { %1277 = vst.msk [vmem:[%s1769_s21 + $0x50] sm:$0xff] %vm333_vm0, %v1261_v10  ;;  %1278 = vst.msk [vmem:[%s1769_s21 + $0x58] sm:$0xff] %vm333_vm0, %v1262_v12  ;;  %v1211_v51 = vmul.f32 %v1641_v49, %v2076_v26  ;;  %v1212_v11 = vmul.f32 %v1641_v49, %v2073_v5 }
 0x67b   : > { %v1239_v13 = vadd.f32 %v2131_v28, %v1221_v36  ;;  %v1240_v1 = vadd.f32 %v2136_v29, %v1222_v39 }
 0x67c   : > { %v1229_v58 = vmul.f32 %v2119_v3, %v1211_v51  ;;  %v1230_v53 = vmul.f32 %v2124_v62, %v1212_v11 }
 0x67d   : > { %v1643_v54 = vpop.eup %1642  ;;  %v1255_v55 = vadd.f32 %v1239_v13, %v1808_v14  ;;  %v1256_v2 = vadd.f32 %v1240_v1, %v1822_v16 }
 0x67e   : > { %v1247_v30 = vadd.f32 %v2131_v28, %v1229_v58  ;;  %v1248_v26 = vadd.f32 %v2136_v29, %v1230_v53  ;;  %v1205_v5 = vmul.f32 %v1643_v54, %v2094_v38  ;;  %v1206_v63 = vmul.f32 %v1643_v54, %v2091_v37 }
 0x67f   : > { %1271 = vst.msk [vmem:[%s1769_s21 + $0x20] sm:$0xff] %vm333_vm0, %v1255_v55  ;;  %1272 = vst.msk [vmem:[%s1769_s21 + $0x28] sm:$0xff] %vm333_vm0, %v1256_v2 }
 0x680   : > { %v1263_v34 = vadd.f32 %v1247_v30, %v1811_v15  ;;  %v1264_v59 = vadd.f32 %v1248_v26, %v1825_v17  ;;  %v1223_v16 = vmul.f32 %v2119_v3, %v1205_v5  ;;  %v1224_v25 = vmul.f32 %v2124_v62, %v1206_v63 }
 0x681   : > { %v1645_v14 = vpop.eup %1644 }
 0x682   : > { %1279 = vst.msk [vmem:[%s1769_s21 + $0x60] sm:$0xff] %vm333_vm0, %v1263_v34  ;;  %1280 = vst.msk [vmem:[%s1769_s21 + $0x68] sm:$0xff] %vm333_vm0, %v1264_v59  ;;  %v1213_v37 = vmul.f32 %v1645_v14, %v2106_v61  ;;  %v1214_v38 = vmul.f32 %v1645_v14, %v2103_v60  ;;  %v1241_v15 = vadd.f32 %v2131_v28, %v1223_v16 }
 0x683   : > { %v1242_v17 = vadd.f32 %v2136_v29, %v1224_v25 }
 0x684   : > { %v1231_v6 = vmul.f32 %v2119_v3, %v1213_v37  ;;  %v1232_v8 = vmul.f32 %v2124_v62, %v1214_v38  ;;  %v1257_v22 = vadd.f32 %v1241_v15, %v1828_v18 }
 0x685   : > { %v1258_v41 = vadd.f32 %v1242_v17, %v1842_v20 }
 0x686   : > { %v1249_v0 = vadd.f32 %v2131_v28, %v1231_v6  ;;  %v1250_v52 = vadd.f32 %v2136_v29, %v1232_v8  ;;  %1273 = vst.msk [vmem:[%s1769_s21 + $0x30] sm:$0xff] %vm333_vm0, %v1257_v22 }
 0x687   : > { %1274 = vst.msk [vmem:[%s1769_s21 + $0x38] sm:$0xff] %vm333_vm0, %v1258_v41 }
 0x688   : > { %v1265_v60 = vadd.f32 %v1249_v0, %v1831_v19  ;;  %v1266_v61 = vadd.f32 %v1250_v52, %v1845_v21 }
 0x68a   : > { %1281 = vst.msk [vmem:[%s1769_s21 + $0x70] sm:$0xff] %vm333_vm0, %v1265_v60  ;;  %1282 = vst.msk [vmem:[%s1769_s21 + $0x78] sm:$0xff] %vm333_vm0, %v1266_v61 }
 0x68b PF: > { %s18_s27 = sadd.s32 1, %s1672_s27  }
 0x68c   : > { %p15_p5 = scmp.ge.s32.totalorder %s18_s27, 4  }
 0x68e   :  { %17 = sbr.rel (!%p15_p5) target bundleno = 1 (0x1), region = 102 }

// kernel: dprnn_forward.2
= control target key start
LH: loop header
LB: loop body
LE: loop exit
PB: predicated region body
PF: predicated region fallthrough
CT: control target
= control target key end

     0   :  { %s2314_s30 = smov 0   ;;  %s2316_s10 = smov 0   ;;  %s2972_s0 = inlined_call_operand.vmem [shape: f32[16,16,32], index: 0, kind: input, shape index: {}]   ;;  %s2973_s1 = inlined_call_operand.vmem [shape: f32[32,128], index: 1, kind: input, shape index: {}]   ;;  %s2974_s2 = inlined_call_operand.vmem [shape: f32[16,64], index: 2, kind: input, shape index: {}]   ;;  %s2975_s3 = inlined_call_operand.vmem [shape: f32[16,64], index: 3, kind: input, shape index: {}]   ;;  %s2976_s4 = inlined_call_operand.vmem [shape: f32[1,128], index: 4, kind: input, shape index: {}]   ;;  %s2977_s5 = inlined_call_operand.vmem [shape: f32[32,32], index: 5, kind: input, shape index: {}]   ;;  %s2978_s6 = inlined_call_operand.vmem [shape: f32[1,32], index: 6, kind: input, shape index: {}]   ;;  %s2979_s7 = inlined_call_operand.vmem [shape: f32[16,1,32], index: 7, kind: input, shape index: {}]   ;;  %s2980_s8 = inlined_call_operand.vmem [shape: f32[16,1,32], index: 8, kind: input, shape index: {}]   ;;  %s2981_s9 = inlined_call_operand.vmem [shape: f32[16,16,32], index: 9, kind: output, shape index: {}]  }
   0x1   :  { %s2318_s11 = smov 0  }
   0x2 LB: > { %s1861_s12 = sadd.s32 4294967295, %s2233_s11   ;;  %s2331_s13 = sadd.s32 1, %s2233_s11   ;;  %s2233_s11 = sphi %s2318_s11, %s2985_s11   ;;  %s2229_s10 = sphi %s2316_s10, %s2984_s10   ;;  %s2225_s30 = sphi %s2314_s30, %s2983_s30  }
   0x3   : > { %s23_s14 = ssub.s32 %s2233_s11, %s2331_s13  ;;  %s26_s15 = sadd.s32 1, %s2229_s10 }
   0x4   : > { %p24_p0 = scmp.eq.s32.totalorder %s23_s14, 0  ;;  %p33_p1 = scmp.ne.s32.totalorder %s2229_s10, %s2225_s30 }
   0x5   : > { %p34_p2 = scmp.eq.s32.totalorder %s2233_s11, 0  ;;  %p231_p3 = scmp.eq.s32.totalorder %s1861_s12, 1 }
   0x6   : > { %s2342_s16 = scalar_select %p24_p0, %s2229_s10, %s26_s15  }
   0x7   : > { %p35_p4 = por %p34_p2, %p33_p1  ;;  %p2344_p5 = por %p231_p3, %p33_p1 }
   0x8   : > { %p1864_p6 = scmp.ge.s32.totalorder %s2233_s11, 2 }
   0xa   : > { %277 = sbr.rel (%p1864_p6) target bundleno = 29 (0x1d), region = 48 }
  0x11   : > { %280 = sbr.rel (!%p35_p4) target bundleno = 29 (0x1d), region = 52  ;;  %s282_s18 = sand.u32 (%p35_p4), 1, %s2229_s10  }
  0x12   : > { %s1866_s19 = sshll.u32 (%p35_p4), %s2233_s11, 3  ;;  %s1865_s20 = sshll.u32 (%p35_p4), %s282_s18, 7 }
  0x13   : > { %s2354_s23 = scalar_lea.vmem (%p35_p4), %s2972_s0, %s1866_s19  ;;  %s284_s24 = scalar_lea.vmem (%p35_p4), [#allocation5], %s1865_s20 }
  0x14   : > { %v344_v0 = vld [vmem:[%s2354_s23] sm:$0xff] (%p35_p4)  ;;  %v346_v1 = vld [vmem:[%s2354_s23 + $0x10] sm:$0xff] (%p35_p4) }
  0x15   : > { %v348_v2 = vld [vmem:[%s2354_s23 + $0x20] sm:$0xff] (%p35_p4)  ;;  %345 = vst [vmem:[%s284_s24] sm:$0xff] (%p35_p4), %v344_v0  ;;  %347 = vst [vmem:[%s284_s24 + $0x8] sm:$0xff] (%p35_p4), %v346_v1  ;;  %v350_v3 = vld [vmem:[%s2354_s23 + $0x30] sm:$0xff] (%p35_p4) }
  0x16   : > { %349 = vst [vmem:[%s284_s24 + $0x10] sm:$0xff] (%p35_p4), %v348_v2  ;;  %v352_v4 = vld [vmem:[%s2354_s23 + $0x40] sm:$0xff] (%p35_p4)  ;;  %v354_v5 = vld [vmem:[%s2354_s23 + $0x50] sm:$0xff] (%p35_p4)  ;;  %351 = vst [vmem:[%s284_s24 + $0x18] sm:$0xff] (%p35_p4), %v350_v3 }
  0x17   : > { %353 = vst [vmem:[%s284_s24 + $0x20] sm:$0xff] (%p35_p4), %v352_v4  ;;  %355 = vst [vmem:[%s284_s24 + $0x28] sm:$0xff] (%p35_p4), %v354_v5  ;;  %v356_v6 = vld [vmem:[%s2354_s23 + $0x60] sm:$0xff] (%p35_p4)  ;;  %v358_v7 = vld [vmem:[%s2354_s23 + $0x70] sm:$0xff] (%p35_p4) }
  0x18   : > { %v360_v8 = vld [vmem:[%s2354_s23 + $0x80] sm:$0xff]  ;;  %357 = vst [vmem:[%s284_s24 + $0x30] sm:$0xff] %v356_v6  ;;  %359 = vst [vmem:[%s284_s24 + $0x38] sm:$0xff] %v358_v7  ;;  %v362_v9 = vld [vmem:[%s2354_s23 + $0x90] sm:$0xff] }
  0x19   : > { %361 = vst [vmem:[%s284_s24 + $0x40] sm:$0xff] %v360_v8  ;;  %v364_v10 = vld [vmem:[%s2354_s23 + $0xa0] sm:$0xff]  ;;  %v366_v11 = vld [vmem:[%s2354_s23 + $0xb0] sm:$0xff]  ;;  %363 = vst [vmem:[%s284_s24 + $0x48] sm:$0xff] %v362_v9 }
  0x1a   : > { %365 = vst [vmem:[%s284_s24 + $0x50] sm:$0xff] %v364_v10  ;;  %367 = vst [vmem:[%s284_s24 + $0x58] sm:$0xff] %v366_v11  ;;  %v368_v12 = vld [vmem:[%s2354_s23 + $0xc0] sm:$0xff]  ;;  %v370_v13 = vld [vmem:[%s2354_s23 + $0xd0] sm:$0xff] }
  0x1b   : > { %v372_v14 = vld [vmem:[%s2354_s23 + $0xe0] sm:$0xff]  ;;  %369 = vst [vmem:[%s284_s24 + $0x60] sm:$0xff] %v368_v12  ;;  %371 = vst [vmem:[%s284_s24 + $0x68] sm:$0xff] %v370_v13  ;;  %v374_v15 = vld [vmem:[%s2354_s23 + $0xf0] sm:$0xff] }
  0x1c   : > { %373 = vst [vmem:[%s284_s24 + $0x70] sm:$0xff] %v372_v14  ;;  %375 = vst [vmem:[%s284_s24 + $0x78] sm:$0xff] %v374_v15 }
  0x1d PF: > { %p1867_p7 = scmp.ge.s32.totalorder %s2233_s11, 1  ;;  %p380_p8 = scmp.lt.s32.totalorder %s2233_s11, 3 }
  0x1f   : > { %p381_p9 = pnand %p1867_p7, %p380_p8 }
  0x20   : > { %v437_v16 = vld [vmem:[%s2973_s1] sm:$0xff] (!%p381_p9)  ;;  %v438_v17 = vld [vmem:[%s2973_s1 + $0x8] sm:$0xff] (!%p381_p9)  ;;  %v439_v18 = vld [vmem:[%s2973_s1 + $0x10] sm:$0xff] (!%p381_p9)  ;;  %s387_s15 = sand.u32 (!%p381_p9), 1, %s2225_s30   ;;  %vm448_vm0 = vcmask (!%p381_p9), 261120   ;;  %v2498_v11 = vmov (!%p381_p9), 0.0  }
  0x21   : > { %384 = sbr.rel (%p381_p9) target bundleno = 1952 (0x7a0), region = 90  ;;  %v2070_v19 = vpack.c.bf16 (!%p381_p9), %v438_v17, %v437_v16  ;;  %v440_v20 = vld [vmem:[%s2973_s1 + $0x18] sm:$0xff] (!%p381_p9)  ;;  %s2387_s20 = sshll.u32 (!%p381_p9), %s387_s15, 7  ;;  %v2475_v38 = vld [vmem:[%s2974_s2] sm:$0xff] (!%p381_p9)  ;;  %v2480_v39 = vld [vmem:[%s2974_s2 + $0x8] sm:$0xff] (!%p381_p9)  ;;  %v2500_v12 = vmov (!%p381_p9), 0.0  }
  0x22   : > { %v2074_v21 = vpack.c.bf16 (!%p381_p9), %v440_v20, %v439_v18  ;;  %s2390_s21 = scalar_lea.vmem (!%p381_p9), [#allocation5], %s2387_s20  ;;  %v2485_v40 = vld [vmem:[%s2975_s3] sm:$0xff] (!%p381_p9)  ;;  %v2490_v41 = vld [vmem:[%s2975_s3 + $0x8] sm:$0xff] (!%p381_p9)  ;;  %s2496_s15 = scalar_lea.vmem (!%p381_p9), [#allocation6], %s2387_s20  ;;  %v2502_v13 = vmov (!%p381_p9), 0.0   ;;  %v2504_v14 = vmov (!%p381_p9), 0.0  }
  0x23   : > { %2071 = vmatprep.subr.bf16.mxu0 (!%p381_p9), %v2070_v19  ;;  %2092 = vmatprep.subr.bf16.mxu1 (!%p381_p9), %v2070_v19  ;;  %v2393_v22 = vld [vmem:[%s2390_s21] sm:$0xff] (!%p381_p9)  ;;  %v2403_v24 = vld [vmem:[%s2390_s21 + $0x8] sm:$0xff] (!%p381_p9)  ;;  %v2409_v26 = vld [vmem:[%s2390_s21 + $0x10] sm:$0xff] (!%p381_p9)  ;;  %s2506_s18 = smov (!%p381_p9), 0  }
  0x24   : > { %v2396_v23 = vld [vmem:[%s2390_s21 + $0x40] sm:$0xff] (!%p381_p9)  ;;  %2073 = vmatpush3.bf16.msra.mxu0 (!%p381_p9), %v2070_v19  ;;  %2094 = vmatpush3.bf16.msra.mxu1 (!%p381_p9), %v2070_v19  ;;  %v2406_v25 = vld [vmem:[%s2390_s21 + $0x48] sm:$0xff] (!%p381_p9)  ;;  %v2412_v27 = vld [vmem:[%s2390_s21 + $0x50] sm:$0xff] (!%p381_p9) }
  0x25   : > { %2075 = vmatprep.subr.bf16.mxu0 (!%p381_p9), %v2074_v21  ;;  %2093 = vmatprep.subr.bf16.mxu1 (!%p381_p9), %v2074_v21  ;;  %v2423_v28 = vld [vmem:[%s2390_s21 + $0x18] sm:$0xff] (!%p381_p9)  ;;  %v2429_v30 = vld [vmem:[%s2390_s21 + $0x20] sm:$0xff] (!%p381_p9)  ;;  %v2443_v32 = vld [vmem:[%s2390_s21 + $0x28] sm:$0xff] (!%p381_p9) }
  0x26   : > { %2000 = vmatprep.mubr.msk.f32.mxu0 (!%p381_p9), %vm448_vm0, %v2393_v22  ;;  %2012 = vmatprep.mubr.msk.f32.mxu1 (!%p381_p9), %vm448_vm0, %v2396_v23  ;;  %v2426_v29 = vld [vmem:[%s2390_s21 + $0x58] sm:$0xff] (!%p381_p9)  ;;  %v2432_v31 = vld [vmem:[%s2390_s21 + $0x60] sm:$0xff] (!%p381_p9)  ;;  %v2446_v33 = vld [vmem:[%s2390_s21 + $0x68] sm:$0xff] (!%p381_p9) }
  0x27   : > { %v2449_v34 = vld [vmem:[%s2390_s21 + $0x30] sm:$0xff] (!%p381_p9)  ;;  %v2463_v36 = vld [vmem:[%s2390_s21 + $0x38] sm:$0xff] (!%p381_p9)  ;;  %v1870_v42 = vld [vmem:[%s2976_s4] ss:$0 sm:$0xff] (!%p381_p9) }
  0x28   : > { %2077 = vmatpush3.bf16.msra.mxu0 %v2074_v21  ;;  %2095 = vmatpush3.bf16.msra.mxu1 %v2074_v21  ;;  %v2452_v35 = vld [vmem:[%s2390_s21 + $0x70] sm:$0xff]  ;;  %v2466_v37 = vld [vmem:[%s2390_s21 + $0x78] sm:$0xff] }
  0x2b   : > { %2001 = vmatmul.mubr.msk.f32.vlgmr.msra.gmra.mrb[0].mxu0 %vm448_vm0, %v2403_v24  ;;  %2013 = vmatmul.mubr.msk.f32.vlgmr.msra.gmra.mrb[0].mxu1 %vm448_vm0, %v2406_v25 }
  0x2c   : > { %2003 = vmatprep.mubr.msk.f32.mxu0 %vm448_vm0, %v2409_v26  ;;  %2015 = vmatprep.mubr.msk.f32.mxu1 %vm448_vm0, %v2412_v27 }
  0x2f   : > { %2004 = vmatmul.mubr.msk.f32.gmra.mrb[2].mxu0 %vm448_vm0, %v2423_v28  ;;  %2016 = vmatmul.mubr.msk.f32.gmra.mrb[2].mxu1 %vm448_vm0, %v2426_v29 }
  0x30   : > { %2006 = vmatprep.mubr.msk.f32.mxu0 %vm448_vm0, %v2429_v30  ;;  %2018 = vmatprep.mubr.msk.f32.mxu1 %vm448_vm0, %v2432_v31 }
  0x33   : > { %2007 = vmatmul.mubr.msk.f32.gmra.mrb[4].mxu0 %vm448_vm0, %v2443_v32  ;;  %2019 = vmatmul.mubr.msk.f32.gmra.mrb[4].mxu1 %vm448_vm0, %v2446_v33 }
  0x34   : > { %2009 = vmatprep.mubr.msk.f32.mxu0 %vm448_vm0, %v2449_v34  ;;  %2021 = vmatprep.mubr.msk.f32.mxu1 %vm448_vm0, %v2452_v35 }
  0x37   : > { %2010 = vmatmul.mubr.msk.f32.gmra.mrb[6].mxu0 %vm448_vm0, %v2463_v36  ;;  %2022 = vmatmul.mubr.msk.f32.gmra.mrb[6].mxu1 %vm448_vm0, %v2466_v37 }
  0xfe   : > { %v2002_v43 = vpop.f32.mrb[0].mxu0  ;;  %v2014_v44 = vpop.f32.mrb[0].mxu1 }
  0xff   : > { %v569_v45 = vadd.f32 %v2002_v43, %v1870_v42  ;;  %v609_v46 = vadd.f32 %v2014_v44, %v1870_v42  ;;  %v563_v47 = vpop.f32.mrb[1].mxu0  ;;  %v603_v48 = vpop.f32.mrb[1].mxu1 }
 0x100   : > { %v564_v49 = vadd.f32 %v1870_v42, %v563_v47  ;;  %v604_v50 = vadd.f32 %v1870_v42, %v603_v48 }
 0x101   : > { %643 = vst [vmem:[#allocation2 + $0x8] sm:$0xff] %v569_v45  ;;  %651 = vst [vmem:[#allocation2 + $0x48] sm:$0xff] %v609_v46 }
 0x102   : > { %642 = vst [vmem:[#allocation2] sm:$0xff] %v564_v49  ;;  %650 = vst [vmem:[#allocation2 + $0x40] sm:$0xff] %v604_v50  ;;  %v2005_v51 = vpop.f32.mrb[2].mxu0  ;;  %v2017_v52 = vpop.f32.mrb[2].mxu1 }
 0x103   : > { %v579_v53 = vadd.f32 %v2005_v51, %v1870_v42  ;;  %v619_v54 = vadd.f32 %v2017_v52, %v1870_v42  ;;  %v573_v55 = vpop.f32.mrb[3].mxu0  ;;  %v613_v56 = vpop.f32.mrb[3].mxu1 }
 0x104   : > { %v574_v57 = vadd.f32 %v1870_v42, %v573_v55  ;;  %v614_v58 = vadd.f32 %v1870_v42, %v613_v56 }
 0x105   : > { %645 = vst [vmem:[#allocation2 + $0x18] sm:$0xff] %v579_v53  ;;  %653 = vst [vmem:[#allocation2 + $0x58] sm:$0xff] %v619_v54 }
 0x106   : > { %644 = vst [vmem:[#allocation2 + $0x10] sm:$0xff] %v574_v57  ;;  %652 = vst [vmem:[#allocation2 + $0x50] sm:$0xff] %v614_v58  ;;  %v2008_v59 = vpop.f32.mrb[4].mxu0  ;;  %v2020_v60 = vpop.f32.mrb[4].mxu1 }
 0x107   : > { %v589_v61 = vadd.f32 %v2008_v59, %v1870_v42  ;;  %v629_v62 = vadd.f32 %v2020_v60, %v1870_v42  ;;  %v583_v63 = vpop.f32.mrb[5].mxu0  ;;  %v623_v0 = vpop.f32.mrb[5].mxu1 }
 0x108   : > { %v584_v1 = vadd.f32 %v1870_v42, %v583_v63  ;;  %v624_v2 = vadd.f32 %v1870_v42, %v623_v0 }
 0x109   : > { %647 = vst [vmem:[#allocation2 + $0x28] sm:$0xff] %v589_v61  ;;  %655 = vst [vmem:[#allocation2 + $0x68] sm:$0xff] %v629_v62 }
 0x10a   : > { %646 = vst [vmem:[#allocation2 + $0x20] sm:$0xff] %v584_v1  ;;  %654 = vst [vmem:[#allocation2 + $0x60] sm:$0xff] %v624_v2  ;;  %v2011_v3 = vpop.f32.mrb[6].mxu0  ;;  %v2023_v4 = vpop.f32.mrb[6].mxu1 }
 0x10b   : > { %v599_v5 = vadd.f32 %v2011_v3, %v1870_v42  ;;  %v639_v6 = vadd.f32 %v2023_v4, %v1870_v42  ;;  %v593_v7 = vpop.f32.mrb[7].mxu0  ;;  %v633_v8 = vpop.f32.mrb[7].mxu1 }
 0x10c   : > { %v594_v9 = vadd.f32 %v1870_v42, %v593_v7  ;;  %v634_v10 = vadd.f32 %v1870_v42, %v633_v8 }
 0x10d   : > { %649 = vst [vmem:[#allocation2 + $0x38] sm:$0xff] %v599_v5  ;;  %657 = vst [vmem:[#allocation2 + $0x78] sm:$0xff] %v639_v6 }
 0x10e   : > { %648 = vst [vmem:[#allocation2 + $0x30] sm:$0xff] %v594_v9  ;;  %656 = vst [vmem:[#allocation2 + $0x70] sm:$0xff] %v634_v10 }
 0x10f LB: >> { %v2082_v15 = vpack.c.bf16 %v2490_v41, %v2485_v40  ;;  %v2255_v16 = vmov 0.0|0.0   ;;  %s2256_s19 = smov 16   ;;  %v2079_v17 = vpack.c.bf16 %v2480_v39, %v2475_v38  ;;  %vm2257_vm1 = vmmov 0   ;;  %s2259_s20 = smov 80   ;;  %s2253_s18 = sphi %s2506_s18, %s667_s18   ;;  %v2249_v14 = vphi %v2504_v14, %v859_v14   ;;  %v2245_v13 = vphi %v2502_v13, %v853_v13   ;;  %v2241_v12 = vphi %v2500_v12, %v883_v12   ;;  %v2237_v11 = vphi %v2498_v11, %v877_v11  }
 0x110   : >> { %2081 = vmatprep.subr.bf16.mxu1 %v2255_v16  ;;  %2078 = vmatprep.subr.bf16.mxu0 %v2255_v16  ;;  %v2258_v18 = vmov 0.0   ;;  %vm678_vm2 = vcmask 130048   ;;  %s1887_s21 = sshll.u32 %s2253_s18, 3  ;;  %s2260_s30 = smov 64  }
 0x111   : >> { %757 = vrot.lane.b32.xlu0 %v2241_v12, %s2256_s19  ;;  %2083 = vmatpush3.bf16.msra.mxu1 %v2082_v15  ;;  %s673_s22 = scalar_lea.vmem [#allocation2], %s1887_s21  ;;  %s2261_s23 = smov 96  }
 0x112   : >> { %2035 = vmatprep.mubr.msk.f32.mxu1 %vm2257_vm1, %v2258_v18  ;;  %2028 = vmatprep.mubr.msk.f32.mxu0 %vm2257_vm1, %v2258_v18  ;;  %s752_s24 = ssub.s32 15, %s2253_s18  ;;  %s2262_s27 = smov 32  }
 0x113   : >> { %2080 = vmatpush3.bf16.msra.mxu0 %v2079_v17  ;;  %s2531_s25 = sshll.u32 %s752_s24, 3  ;;  %s888_s28 = scalar_lea.vmem [#allocation3], %s1887_s21 }
 0x114   : >> { %s754_s26 = scalar_lea.vmem [#allocation2], %s2531_s25  ;;  %s894_s29 = scalar_lea.vmem [#allocation4], %s2531_s25 }
 0x115   : >> { %676 = vrot.lane.b32.xlu0 %v2249_v14, %s2259_s20  ;;  %v674_v43 = vld [vmem:[%s673_s22] sm:$0xff]  ;;  %s667_s18 = sadd.s32 1, %s2253_s18  }
 0x116   : >> { %v755_v50 = vld [vmem:[%s754_s26] sm:$0xff]  ;;  %p664_p10 = scmp.ge.s32.totalorder %s667_s18, 16  }
 0x117   : > { %s2263_s14 = smov (%p664_p10), 16   ;;  %v1010_v38 = vld [vmem:[%s2977_s5 + $0x8] sm:$0xff] (%p664_p10)  ;;  %v1011_v41 = vld [vmem:[%s2977_s5 + $0x10] sm:$0xff] (%p664_p10) }
 0x183   : >> { %v758_v19 = vpop.permute.xlu0 %757 }
 0x184   : >> { %2036 = vmatmul.mubr.msk.f32.vlgmr.msra.gmra.mrb[0].mxu1 %vm678_vm2, %v758_v19 }
 0x187   : >> { %v677_v20 = vpop.permute.xlu0 %676 }
 0x188   : >> { %2029 = vmatmul.mubr.msk.f32.vlgmr.msra.gmra.mrb[0].mxu0 %vm678_vm2, %v677_v20 }
 0x257   : >> { %v827_v21 = vpop.f32.mrb[0].mxu1 }
 0x258   : >> { %832 = vrot.lane.b32.xlu1 %v827_v21, %s2260_s30  ;;  %v2037_v42 = vpop.f32.mrb[1].mxu1 }
 0x25b   : >> { %v747_v44 = vpop.f32.mrb[0].mxu0 }
 0x25c   : >> { %v751_v45 = vadd.f32 %v747_v44, %v674_v43  ;;  %v2030_v46 = vpop.f32.mrb[1].mxu0 }
 0x25e   : >> { %2173 = vtanh.f32 %v751_v45  ;;  %v1891_v48 = vmul.f32 -1.442695, %v751_v45 }
 0x260   : >> { %2175 = vpow2.f32 %v1891_v48 }
 0x268   : >> { %v2174_v47 = vpop.eup %2173 }
 0x269   : >> { %845 = vrot.lane.b32.xlu1 %v2174_v47, %s2261_s23 }
 0x26a   : >> { %v2176_v49 = vpop.eup %2175 }
 0x26b   : >> { %v839_v52 = vadd.f32 1.0, %v2176_v49 }
 0x2ca   : >> { %v833_v51 = vpop.permute.xlu1 %832 }
 0x2cb   : >> { %v835_v53 = vadd.f32 %v833_v51, %v755_v50 }
 0x2cd   : >> { %2177 = vtanh.f32 %v835_v53  ;;  %v1892_v58 = vmul.f32 -1.442695, %v835_v53 }
 0x2ce   : >> { %2179 = vrcp.f32 %v839_v52 }
 0x2cf   : >> { %2181 = vpow2.f32 %v1892_v58 }
 0x2d7   : >> { %v2178_v54 = vpop.eup %2177 }
 0x2d8   : >> { %869 = vrot.lane.b32.xlu0 %v2178_v54, %s2261_s23  ;;  %v2180_v55 = vpop.eup %2179 }
 0x2d9   : >> { %v2182_v59 = vpop.eup %2181  ;;  %v843_v0 = vmul.f32 %v2245_v13, %v2180_v55 }
 0x2da   : >> { %v863_v60 = vadd.f32 1.0, %v2182_v59 }
 0x2db   : >> { %v846_v56 = vpop.permute.xlu1 %845 }
 0x2dc   : >> { %v848_v57 = vmul.f32 %v2180_v55, %v846_v56  ;;  %2183 = vrcp.f32 %v863_v60 }
 0x2de   : >> { %850 = vrot.lane.b32.xlu1 %v848_v57, %s2256_s19 }
 0x2e6   : >> { %v2184_v61 = vpop.eup %2183 }
 0x2e7   : >> { %v867_v3 = vmul.f32 %v2237_v11, %v2184_v61 }
 0x34a   : >> { %v870_v62 = vpop.permute.xlu0 %869 }
 0x34b   : >> { %v872_v63 = vmul.f32 %v2184_v61, %v870_v62 }
 0x34d   : >> { %874 = vrot.lane.b32.xlu0 %v872_v63, %s2256_s19 }
 0x350   : >> { %v851_v1 = vpop.permute.xlu1 %850 }
 0x351   : >> { %v853_v13 = vadd.f32 %v851_v1, %v843_v0  }
 0x353   : >> { %2185 = vtanh.f32 %v853_v13 }
 0x35d   : >> { %v2186_v2 = vpop.eup %2185 }
 0x35e   : >> { %856 = vrot.lane.b32.xlu1 %v2186_v2, %s2262_s27 }
 0x3bf   : >> { %v875_v4 = vpop.permute.xlu0 %874 }
 0x3c0   : >> { %v877_v11 = vadd.f32 %v875_v4, %v867_v3  }
 0x3c2   : >> { %2187 = vtanh.f32 %v877_v11  ;;  %v1012_v11 = vld [vmem:[%s2977_s5 + $0x18] sm:$0xff] (%p664_p10) }
 0x3cc   : >> { %v2188_v5 = vpop.eup %2187 }
 0x3cd   : >> { %880 = vrot.lane.b32.xlu0 %v2188_v5, %s2262_s27 }
 0x3d0   : >> { %v857_v6 = vpop.permute.xlu1 %856 }
 0x3d1   : >> { %v859_v14 = vmul.f32 %v2180_v55, %v857_v6  }
 0x3d3   : >> { %885 = vrot.lane.b32.xlu1 %v859_v14, %s2259_s20  ;;  %v1009_v14 = vld [vmem:[%s2977_s5] sm:$0xff] (%p664_p10) }
 0x3d4   : > { %v2084_v40 = vpack.c.bf16 (%p664_p10), %v1010_v38, %v1009_v14 }
 0x3d6   : > { %2085 = vmatprep.subr.bf16.mxu0 (%p664_p10), %v2084_v40  ;;  %2096 = vmatprep.subr.bf16.mxu1 (%p664_p10), %v2084_v40 }
 0x3d7   : > { %2087 = vmatpush3.bf16.msra.mxu0 (%p664_p10), %v2084_v40  ;;  %2098 = vmatpush3.bf16.msra.mxu1 (%p664_p10), %v2084_v40 }
 0x43f   : >> { %v881_v7 = vpop.permute.xlu0 %880 }
 0x440   : >> { %v883_v12 = vmul.f32 %v2184_v61, %v881_v7  }
 0x442   : >> { %891 = vrot.lane.b32.xlu0 %v883_v12, %s2256_s19  ;;  %v2088_v12 = vpack.c.bf16 (%p664_p10), %v1012_v11, %v1011_v41 }
 0x444   : > { %2089 = vmatprep.subr.bf16.mxu0 (%p664_p10), %v2088_v12  ;;  %2097 = vmatprep.subr.bf16.mxu1 (%p664_p10), %v2088_v12 }
 0x445   : >> { %v886_v8 = vpop.permute.xlu1 %885  ;;  %2091 = vmatpush3.bf16.msra.mxu0 (%p664_p10), %v2088_v12  ;;  %2099 = vmatpush3.bf16.msra.mxu1 (%p664_p10), %v2088_v12 }
 0x446   : >> { %889 = vst.msk [vmem:[%s888_s28] sm:$0xff] %vm678_vm2, %v886_v8 }
 0x44d   : > { %v896_v48 = vld [vmem:[#allocation3] sm:$0xff] (%p664_p10)  ;;  %v898_v52 = vld [vmem:[#allocation3 + $0x10] sm:$0xff] (%p664_p10)  ;;  %v897_v53 = vld [vmem:[#allocation3 + $0x8] sm:$0xff] (%p664_p10) }
 0x44e   : > { %v899_v57 = vld [vmem:[#allocation3 + $0x18] sm:$0xff] (%p664_p10)  ;;  %v900_v59 = vld [vmem:[#allocation3 + $0x20] sm:$0xff] (%p664_p10)  ;;  %v901_v63 = vld [vmem:[#allocation3 + $0x28] sm:$0xff] (%p664_p10) }
 0x44f   : > { %v902_v1 = vld [vmem:[#allocation3 + $0x30] sm:$0xff] (%p664_p10)  ;;  %v903_v5 = vld [vmem:[#allocation3 + $0x38] sm:$0xff] (%p664_p10)  ;;  %v905_v7 = vld [vmem:[#allocation3 + $0x48] sm:$0xff] (%p664_p10) }
 0x450   : > { %v904_v8 = vld [vmem:[#allocation3 + $0x40] sm:$0xff] (%p664_p10)  ;;  %v907_v14 = vld [vmem:[#allocation3 + $0x58] sm:$0xff] (%p664_p10)  ;;  %v909_v12 = vld [vmem:[#allocation3 + $0x68] sm:$0xff] (%p664_p10) }
 0x451   : > { %v908_v11 = vld [vmem:[#allocation3 + $0x60] sm:$0xff] (%p664_p10) }
 0x4af   : > { %666 = sbr.rel (!%p664_p10) target bundleno = 271 (0x10f), region = 178 }
 0x4b4   : >> { %v892_v9 = vpop.permute.xlu0 %891 }
 0x4b5   : >> { %895 = vst.msk [vmem:[%s894_s29] sm:$0xff] %vm678_vm2, %v892_v9 }
 0x4b6   : > { %s1943_s30 = sshll.u32 (%p2344_p5), %s1861_s12, 3 }
 0x4b7   : > { %s1687_s17 = scalar_lea.vmem (%p2344_p5), %s2981_s9, %s1943_s30 }
 0x4bc   : > { %v912_v10 = vld [vmem:[#allocation4] sm:$0xff]  ;;  %v914_v15 = vld [vmem:[#allocation4 + $0x10] sm:$0xff]  ;;  %v913_v16 = vld [vmem:[#allocation4 + $0x8] sm:$0xff] }
 0x4bd   : > { %944 = vrot.lane.b32.xlu0 %v912_v10, %s2263_s14  ;;  %948 = vrot.lane.b32.xlu1 %v914_v15, %s2263_s14  ;;  %v915_v17 = vld [vmem:[#allocation4 + $0x18] sm:$0xff]  ;;  %v916_v18 = vld [vmem:[#allocation4 + $0x20] sm:$0xff]  ;;  %v917_v39 = vld [vmem:[#allocation4 + $0x28] sm:$0xff] }
 0x4be   : > { %v918_v13 = vld [vmem:[#allocation4 + $0x30] sm:$0xff]  ;;  %v919_v19 = vld [vmem:[#allocation4 + $0x38] sm:$0xff]  ;;  %v920_v20 = vld [vmem:[#allocation4 + $0x40] sm:$0xff] }
 0x4bf   : > { %v921_v21 = vld [vmem:[#allocation4 + $0x48] sm:$0xff]  ;;  %v922_v42 = vld [vmem:[#allocation4 + $0x50] sm:$0xff]  ;;  %v923_v43 = vld [vmem:[#allocation4 + $0x58] sm:$0xff] }
 0x4c0   : > { %v924_v44 = vld [vmem:[#allocation4 + $0x60] sm:$0xff]  ;;  %v925_v45 = vld [vmem:[#allocation4 + $0x68] sm:$0xff]  ;;  %v926_v46 = vld [vmem:[#allocation4 + $0x70] sm:$0xff] }
 0x4c1   : > { %946 = vrot.lane.b32.xlu0 %v913_v16, %s2263_s14  ;;  %950 = vrot.lane.b32.xlu1 %v915_v17, %s2263_s14  ;;  %v927_v47 = vld [vmem:[#allocation4 + $0x78] sm:$0xff] }
 0x4c5   : > { %952 = vrot.lane.b32.xlu0 %v916_v18, %s2263_s14  ;;  %954 = vrot.lane.b32.xlu1 %v917_v39, %s2263_s14  ;;  %v906_v18 = vld [vmem:[#allocation3 + $0x50] sm:$0xff] }
 0x4c9   : > { %956 = vrot.lane.b32.xlu0 %v918_v13, %s2263_s14  ;;  %958 = vrot.lane.b32.xlu1 %v919_v19, %s2263_s14 }
 0x4cd   : > { %960 = vrot.lane.b32.xlu0 %v920_v20, %s2263_s14  ;;  %962 = vrot.lane.b32.xlu1 %v921_v21, %s2263_s14 }
 0x4d1   : > { %964 = vrot.lane.b32.xlu0 %v922_v42, %s2263_s14  ;;  %966 = vrot.lane.b32.xlu1 %v923_v43, %s2263_s14  ;;  %v910_v42 = vld [vmem:[#allocation3 + $0x70] sm:$0xff]  ;;  %v911_v43 = vld [vmem:[#allocation3 + $0x78] sm:$0xff] }
 0x4d5   : > { %968 = vrot.lane.b32.xlu0 %v924_v44, %s2263_s14  ;;  %970 = vrot.lane.b32.xlu1 %v925_v45, %s2263_s14 }
 0x4d9   : > { %972 = vrot.lane.b32.xlu0 %v926_v46, %s2263_s14  ;;  %974 = vrot.lane.b32.xlu1 %v927_v47, %s2263_s14 }
 0x52f   : > { %v945_v49 = vpop.permute.xlu0 %944  ;;  %v949_v50 = vpop.permute.xlu1 %948 }
 0x530   : > { %v993_v51 = vsel %vm678_vm2, %v896_v48, %v945_v49  ;;  %v995_v54 = vsel %vm678_vm2, %v898_v52, %v949_v50  ;;  %v1893_v48 = vld [vmem:[%s2978_s6] ss:$0 sm:$0xff] }
 0x531   : > { %2046 = vmatprep.mubr.msk.f32.mxu0 %vm448_vm0, %v993_v51 }
 0x533   : > { %v947_v55 = vpop.permute.xlu0 %946  ;;  %v951_v56 = vpop.permute.xlu1 %950 }
 0x534   : > { %v994_v58 = vsel %vm678_vm2, %v897_v53, %v947_v55  ;;  %v996_v60 = vsel %vm678_vm2, %v899_v57, %v951_v56 }
 0x535   : > { %2047 = vmatmul.mubr.msk.f32.vlgmr.msra.gmra.mrb[0].mxu0 %vm448_vm0, %v994_v58 }
 0x536   : > { %2049 = vmatprep.mubr.msk.f32.mxu0 %vm448_vm0, %v995_v54 }
 0x537   : > { %v953_v61 = vpop.permute.xlu0 %952  ;;  %v955_v62 = vpop.permute.xlu1 %954 }
 0x538   : > { %v997_v0 = vsel %vm678_vm2, %v900_v59, %v953_v61  ;;  %v998_v2 = vsel %vm678_vm2, %v901_v63, %v955_v62 }
 0x539   : > { %2050 = vmatmul.mubr.msk.f32.gmra.mrb[2].mxu0 %vm448_vm0, %v996_v60 }
 0x53a   : > { %2052 = vmatprep.mubr.msk.f32.mxu0 %vm448_vm0, %v997_v0 }
 0x53b   : > { %v957_v3 = vpop.permute.xlu0 %956  ;;  %v959_v4 = vpop.permute.xlu1 %958 }
 0x53c   : > { %v999_v6 = vsel %vm678_vm2, %v902_v1, %v957_v3  ;;  %v1000_v9 = vsel %vm678_vm2, %v903_v5, %v959_v4 }
 0x53d   : > { %2053 = vmatmul.mubr.msk.f32.gmra.mrb[4].mxu0 %vm448_vm0, %v998_v2 }
 0x53e   : > { %2055 = vmatprep.mubr.msk.f32.mxu0 %vm448_vm0, %v999_v6 }
 0x53f   : > { %v961_v10 = vpop.permute.xlu0 %960  ;;  %v963_v15 = vpop.permute.xlu1 %962 }
 0x540   : > { %v1002_v16 = vsel %vm678_vm2, %v905_v7, %v963_v15  ;;  %v1001_v17 = vsel %vm678_vm2, %v904_v8, %v961_v10 }
 0x541   : > { %2056 = vmatmul.mubr.msk.f32.gmra.mrb[6].mxu0 %vm448_vm0, %v1000_v9  ;;  %2058 = vmatprep.mubr.msk.f32.mxu1 %vm448_vm0, %v1001_v17 }
 0x542   : > { %2059 = vmatmul.mubr.msk.f32.vlgmr.msra.gmra.mrb[0].mxu1 %vm448_vm0, %v1002_v16 }
 0x543   : > { %v965_v38 = vpop.permute.xlu0 %964  ;;  %v967_v39 = vpop.permute.xlu1 %966 }
 0x544   : > { %v1003_v40 = vsel %vm678_vm2, %v906_v18, %v965_v38  ;;  %v1004_v41 = vsel %vm678_vm2, %v907_v14, %v967_v39 }
 0x545   : > { %2061 = vmatprep.mubr.msk.f32.mxu1 %vm448_vm0, %v1003_v40 }
 0x546   : > { %2062 = vmatmul.mubr.msk.f32.gmra.mrb[2].mxu1 %vm448_vm0, %v1004_v41 }
 0x547   : > { %v969_v13 = vpop.permute.xlu0 %968  ;;  %v971_v19 = vpop.permute.xlu1 %970 }
 0x548   : > { %v1005_v20 = vsel %vm678_vm2, %v908_v11, %v969_v13  ;;  %v1006_v21 = vsel %vm678_vm2, %v909_v12, %v971_v19 }
 0x549   : > { %2064 = vmatprep.mubr.msk.f32.mxu1 %vm448_vm0, %v1005_v20 }
 0x54a   : > { %2065 = vmatmul.mubr.msk.f32.gmra.mrb[4].mxu1 %vm448_vm0, %v1006_v21 }
 0x54b   : > { %v973_v44 = vpop.permute.xlu0 %972  ;;  %v975_v45 = vpop.permute.xlu1 %974 }
 0x54c   : > { %v1007_v46 = vsel %vm678_vm2, %v910_v42, %v973_v44  ;;  %v1008_v47 = vsel %vm678_vm2, %v911_v43, %v975_v45 }
 0x54d   : > { %2067 = vmatprep.mubr.msk.f32.mxu1 %vm448_vm0, %v1007_v46 }
 0x54e   : > { %2068 = vmatmul.mubr.msk.f32.gmra.mrb[6].mxu1 %vm448_vm0, %v1008_v47 }
 0x608   : > { %v2048_v49 = vpop.f32.mrb[0].mxu0 }
 0x609   : > { %v2619_v50 = vadd.f32 %v2048_v49, %v1893_v48  ;;  %v1134_v51 = vpop.f32.mrb[1].mxu0 }
 0x60a   : > { %v2621_v52 = vadd.f32 %v1893_v48, %v1134_v51 }
 0x60b   : > { %v1216_v53 = vsel %vm448_vm0, %v2619_v50, 0.0 }
 0x60c   : > { %1217 = vadd.xlane.f32.xlu1 %v1216_v53  ;;  %v2051_v54 = vpop.f32.mrb[2].mxu0  ;;  %v1213_v55 = vsel %vm448_vm0, %v2621_v52, 0.0 }
 0x60d   : > { %v1144_v56 = vpop.f32.mrb[3].mxu0  ;;  %1214 = vadd.xlane.f32.xlu0 %v1213_v55  ;;  %v2629_v58 = vadd.f32 %v2051_v54, %v1893_v48 }
 0x60e   : > { %v2627_v57 = vadd.f32 %v1893_v48, %v1144_v56 }
 0x60f   : > { %v1222_v1 = vsel %vm448_vm0, %v2629_v58, 0.0 }
 0x610   : > { %v2054_v59 = vpop.f32.mrb[4].mxu0  ;;  %v1219_v60 = vsel %vm448_vm0, %v2627_v57, 0.0 }
 0x611   : > { %1220 = vadd.xlane.f32.xlu0 %v1219_v60  ;;  %v1154_v61 = vpop.f32.mrb[5].mxu0  ;;  %v2635_v63 = vadd.f32 %v2054_v59, %v1893_v48 }
 0x612   : > { %v2633_v62 = vadd.f32 %v1893_v48, %v1154_v61 }
 0x613   : > { %v1228_v9 = vsel %vm448_vm0, %v2635_v63, 0.0 }
 0x614   : > { %v2057_v0 = vpop.f32.mrb[6].mxu0  ;;  %v1225_v2 = vsel %vm448_vm0, %v2633_v62, 0.0 }
 0x615   : > { %1223 = vadd.xlane.f32.xlu0 %v1222_v1  ;;  %v1164_v3 = vpop.f32.mrb[7].mxu0  ;;  %1226 = vadd.xlane.f32.xlu1 %v1225_v2  ;;  %v2060_v4 = vpop.f32.mrb[0].mxu1  ;;  %v2645_v8 = vadd.f32 %v2057_v0, %v1893_v48 }
 0x616   : > { %v2641_v5 = vadd.f32 %v1893_v48, %v1164_v3  ;;  %v1174_v6 = vpop.f32.mrb[1].mxu1  ;;  %v2655_v14 = vadd.f32 %v2060_v4, %v1893_v48 }
 0x617   : > { %v2643_v7 = vadd.f32 %v1893_v48, %v1174_v6  ;;  %v1234_v38 = vsel %vm448_vm0, %v2645_v8, 0.0 }
 0x618   : > { %v1231_v10 = vsel %vm448_vm0, %v2641_v5, 0.0  ;;  %v1240_v13 = vsel %vm448_vm0, %v2655_v14, 0.0 }
 0x619   : > { %1229 = vadd.xlane.f32.xlu0 %v1228_v9  ;;  %1232 = vadd.xlane.f32.xlu1 %v1231_v10  ;;  %v2063_v15 = vpop.f32.mrb[2].mxu1  ;;  %v1237_v17 = vsel %vm448_vm0, %v2643_v7, 0.0 }
 0x61a   : > { %v1184_v16 = vpop.f32.mrb[3].mxu1  ;;  %v2663_v12 = vadd.f32 %v2063_v15, %v1893_v48 }
 0x61b   : > { %v2653_v18 = vadd.f32 %v1893_v48, %v1184_v16 }
 0x61c   : > { %v1246_v44 = vsel %vm448_vm0, %v2663_v12, 0.0 }
 0x61d   : > { %1235 = vadd.xlane.f32.xlu0 %v1234_v38  ;;  %1238 = vadd.xlane.f32.xlu1 %v1237_v17  ;;  %v2066_v39 = vpop.f32.mrb[4].mxu1  ;;  %v1243_v41 = vsel %vm448_vm0, %v2653_v18, 0.0 }
 0x61e   : > { %v1194_v40 = vpop.f32.mrb[5].mxu1  ;;  %v2671_v43 = vadd.f32 %v2066_v39, %v1893_v48 }
 0x61f   : > { %v2661_v11 = vadd.f32 %v1893_v48, %v1194_v40 }
 0x620   : > { %v1252_v47 = vsel %vm448_vm0, %v2671_v43, 0.0 }
 0x621   : > { %1241 = vadd.xlane.f32.xlu0 %v1240_v13  ;;  %1244 = vadd.xlane.f32.xlu1 %v1243_v41  ;;  %v2069_v19 = vpop.f32.mrb[6].mxu1  ;;  %v1249_v21 = vsel %vm448_vm0, %v2661_v11, 0.0 }
 0x622   : > { %v1204_v20 = vpop.f32.mrb[7].mxu1  ;;  %v2677_v46 = vadd.f32 %v2069_v19, %v1893_v48 }
 0x623   : > { %v2669_v42 = vadd.f32 %v1893_v48, %v1204_v20 }
 0x624   : > { %v1258_v49 = vsel %vm448_vm0, %v2677_v46, 0.0 }
 0x625   : > { %1247 = vadd.xlane.f32.xlu0 %v1246_v44  ;;  %1250 = vadd.xlane.f32.xlu1 %v1249_v21  ;;  %v1255_v45 = vsel %vm448_vm0, %v2669_v42, 0.0 }
 0x629   : > { %1253 = vadd.xlane.f32.xlu0 %v1252_v47  ;;  %1256 = vadd.xlane.f32.xlu1 %v1255_v45 }
 0x62d   : > { %1259 = vadd.xlane.f32.xlu0 %v1258_v49 }
 0x699   : > { %v1218_v53 = vpop.xlane.xlu1 %1217 }
 0x69a   : > { %v1215_v51 = vpop.xlane.xlu0 %1214 }
 0x69b   : > { %v1261_v55 = vadd.f32 %v1218_v53, %v1215_v51 }
 0x69e   : > { %v1221_v54 = vpop.xlane.xlu0 %1220 }
 0x69f   : > { %v1262_v56 = vadd.f32 %v1261_v55, %v1221_v54 }
 0x6a2   : > { %v1224_v59 = vpop.xlane.xlu0 %1223  ;;  %v1227_v60 = vpop.xlane.xlu1 %1226 }
 0x6a3   : > { %v1263_v61 = vadd.f32 %v1262_v56, %v1224_v59 }
 0x6a5   : > { %v1264_v0 = vadd.f32 %v1263_v61, %v1227_v60 }
 0x6a6   : > { %v1230_v48 = vpop.xlane.xlu0 %1229  ;;  %v1233_v1 = vpop.xlane.xlu1 %1232 }
 0x6a7   : > { %v1265_v2 = vadd.f32 %v1264_v0, %v1230_v48 }
 0x6a9   : > { %v1266_v3 = vadd.f32 %v1265_v2, %v1233_v1 }
 0x6aa   : > { %v1236_v4 = vpop.xlane.xlu0 %1235  ;;  %v1239_v6 = vpop.xlane.xlu1 %1238 }
 0x6ab   : > { %v1267_v9 = vadd.f32 %v1266_v3, %v1236_v4 }
 0x6ad   : > { %v1268_v10 = vadd.f32 %v1267_v9, %v1239_v6 }
 0x6ae   : > { %v1242_v15 = vpop.xlane.xlu0 %1241  ;;  %v1245_v16 = vpop.xlane.xlu1 %1244 }
 0x6af   : > { %v1269_v17 = vadd.f32 %v1268_v10, %v1242_v15 }
 0x6b1   : > { %v1270_v38 = vadd.f32 %v1269_v17, %v1245_v16 }
 0x6b2   : > { %v1248_v39 = vpop.xlane.xlu0 %1247  ;;  %v1251_v40 = vpop.xlane.xlu1 %1250 }
 0x6b3   : > { %v1271_v41 = vadd.f32 %v1270_v38, %v1248_v39 }
 0x6b5   : > { %v1272_v13 = vadd.f32 %v1271_v41, %v1251_v40 }
 0x6b6   : > { %v1254_v19 = vpop.xlane.xlu0 %1253  ;;  %v1257_v20 = vpop.xlane.xlu1 %1256 }
 0x6b7   : > { %v1273_v21 = vadd.f32 %v1272_v13, %v1254_v19 }
 0x6b9   : > { %v1274_v44 = vadd.f32 %v1273_v21, %v1257_v20 }
 0x6ba   : > { %v1260_v45 = vpop.xlane.xlu0 %1259 }
 0x6bb   : > { %v1275_v47 = vadd.f32 %v1274_v44, %v1260_v45 }
 0x6bd   : > { %v1276_v49 = vmul.f32 0.001953125, %v1275_v47 }
 0x6bf   : > { %v2684_v51 = vsub.f32 %v2619_v50, %v1276_v49  ;;  %v2687_v53 = vsub.f32 %v2621_v52, %v1276_v49  ;;  %v2690_v54 = vsub.f32 %v2629_v58, %v1276_v49  ;;  %v2693_v55 = vsub.f32 %v2627_v57, %v1276_v49 }
 0x6c0   : > { %v2700_v60 = vsub.f32 %v2635_v63, %v1276_v49  ;;  %v2703_v50 = vsub.f32 %v2633_v62, %v1276_v49  ;;  %v2712_v0 = vsub.f32 %v2645_v8, %v1276_v49  ;;  %v2715_v63 = vsub.f32 %v2641_v5, %v1276_v49 }
 0x6c1   : > { %v1294_v56 = vmul.f32 %v2684_v51, %v2684_v51  ;;  %v1293_v59 = vmul.f32 %v2687_v53, %v2687_v53  ;;  %v1296_v57 = vmul.f32 %v2690_v54, %v2690_v54  ;;  %v1295_v61 = vmul.f32 %v2693_v55, %v2693_v55 }
 0x6c2   : > { %v1298_v1 = vmul.f32 %v2700_v60, %v2700_v60  ;;  %v1297_v2 = vmul.f32 %v2703_v50, %v2703_v50  ;;  %v1300_v3 = vmul.f32 %v2712_v0, %v2712_v0  ;;  %v1299_v8 = vmul.f32 %v2715_v63, %v2715_v63 }
 0x6c3   : > { %v1312_v52 = vsel %vm448_vm0, %v1294_v56, 0.0  ;;  %v1309_v58 = vsel %vm448_vm0, %v1293_v59, 0.0  ;;  %v1318_v62 = vsel %vm448_vm0, %v1296_v57, 0.0  ;;  %v1315_v48 = vsel %vm448_vm0, %v1295_v61, 0.0 }
 0x6c4   : > { %1313 = vadd.xlane.f32.xlu0 %v1312_v52  ;;  %1310 = vadd.xlane.f32.xlu1 %v1309_v58  ;;  %v1324_v5 = vsel %vm448_vm0, %v1298_v1, 0.0  ;;  %v1321_v4 = vsel %vm448_vm0, %v1297_v2, 0.0  ;;  %v2730_v6 = vsub.f32 %v2655_v14, %v1276_v49  ;;  %v2733_v9 = vsub.f32 %v2643_v7, %v1276_v49 }
 0x6c5   : > { %v1330_v10 = vsel %vm448_vm0, %v1300_v3, 0.0  ;;  %v1327_v15 = vsel %vm448_vm0, %v1299_v8, 0.0  ;;  %v2742_v38 = vsub.f32 %v2663_v12, %v1276_v49  ;;  %v2745_v14 = vsub.f32 %v2653_v18, %v1276_v49 }
 0x6c6   : > { %v1302_v16 = vmul.f32 %v2730_v6, %v2730_v6  ;;  %v1301_v17 = vmul.f32 %v2733_v9, %v2733_v9  ;;  %v2748_v7 = vsub.f32 %v2671_v43, %v1276_v49  ;;  %v2751_v39 = vsub.f32 %v2661_v11, %v1276_v49 }
 0x6c7   : > { %v1304_v13 = vmul.f32 %v2742_v38, %v2742_v38  ;;  %v1303_v12 = vmul.f32 %v2745_v14, %v2745_v14  ;;  %v2760_v18 = vsub.f32 %v2677_v46, %v1276_v49  ;;  %v2763_v43 = vsub.f32 %v2669_v42, %v1276_v49 }
 0x6c8   : > { %1319 = vadd.xlane.f32.xlu0 %v1318_v62  ;;  %1316 = vadd.xlane.f32.xlu1 %v1315_v48  ;;  %v1336_v40 = vsel %vm448_vm0, %v1302_v16, 0.0  ;;  %v1333_v41 = vsel %vm448_vm0, %v1301_v17, 0.0  ;;  %v1306_v20 = vmul.f32 %v2748_v7, %v2748_v7  ;;  %v1305_v21 = vmul.f32 %v2751_v39, %v2751_v39 }
 0x6c9   : > { %v1342_v11 = vsel %vm448_vm0, %v1304_v13, 0.0  ;;  %v1339_v19 = vsel %vm448_vm0, %v1303_v12, 0.0  ;;  %v1308_v42 = vmul.f32 %v2760_v18, %v2760_v18  ;;  %v1307_v45 = vmul.f32 %v2763_v43, %v2763_v43 }
 0x6ca   : > { %v1348_v44 = vsel %vm448_vm0, %v1306_v20, 0.0  ;;  %v1345_v46 = vsel %vm448_vm0, %v1305_v21, 0.0 }
 0x6cb   : > { %v1354_v47 = vsel %vm448_vm0, %v1308_v42, 0.0  ;;  %v1351_v49 = vsel %vm448_vm0, %v1307_v45, 0.0 }
 0x6cc   : > { %1325 = vadd.xlane.f32.xlu0 %v1324_v5  ;;  %1322 = vadd.xlane.f32.xlu1 %v1321_v4 }
 0x6d0   : > { %1331 = vadd.xlane.f32.xlu0 %v1330_v10  ;;  %1328 = vadd.xlane.f32.xlu1 %v1327_v15 }
 0x6d4   : > { %1337 = vadd.xlane.f32.xlu0 %v1336_v40  ;;  %1334 = vadd.xlane.f32.xlu1 %v1333_v41 }
 0x6d8   : > { %1343 = vadd.xlane.f32.xlu0 %v1342_v11  ;;  %1340 = vadd.xlane.f32.xlu1 %v1339_v19 }
 0x6dc   : > { %1349 = vadd.xlane.f32.xlu0 %v1348_v44  ;;  %1346 = vadd.xlane.f32.xlu1 %v1345_v46 }
 0x6e0   : > { %1355 = vadd.xlane.f32.xlu0 %v1354_v47  ;;  %1352 = vadd.xlane.f32.xlu1 %v1351_v49 }
 0x751   : > { %v1314_v56 = vpop.xlane.xlu0 %1313  ;;  %v1311_v59 = vpop.xlane.xlu1 %1310 }
 0x752   : > { %v1357_v52 = vadd.f32 %v1314_v56, %v1311_v59 }
 0x755   : > { %v1320_v58 = vpop.xlane.xlu0 %1319  ;;  %v1317_v57 = vpop.xlane.xlu1 %1316 }
 0x756   : > { %v1358_v61 = vadd.f32 %v1357_v52, %v1317_v57  ;;  %v1910_v52 = vld [vmem:[%s2979_s7] ss:$0 sm:$0xff]  ;;  %v1912_v57 = vld [vmem:[%s2979_s7 + $0x2] ss:$0 sm:$0xff] }
 0x758   : > { %v1359_v62 = vadd.f32 %v1358_v61, %v1320_v58  ;;  %v1911_v58 = vld [vmem:[%s2979_s7 + $0x1] ss:$0 sm:$0xff]  ;;  %v1913_v61 = vld [vmem:[%s2979_s7 + $0x3] ss:$0 sm:$0xff] }
 0x759   : > { %v1326_v48 = vpop.xlane.xlu0 %1325  ;;  %v1323_v1 = vpop.xlane.xlu1 %1322 }
 0x75a   : > { %v1360_v2 = vadd.f32 %v1359_v62, %v1323_v1  ;;  %v1914_v62 = vld [vmem:[%s2979_s7 + $0x4] ss:$0 sm:$0xff]  ;;  %v1916_v1 = vld [vmem:[%s2979_s7 + $0x6] ss:$0 sm:$0xff] }
 0x75c   : > { %v1361_v3 = vadd.f32 %v1360_v2, %v1326_v48  ;;  %v1915_v48 = vld [vmem:[%s2979_s7 + $0x5] ss:$0 sm:$0xff]  ;;  %v1917_v2 = vld [vmem:[%s2979_s7 + $0x7] ss:$0 sm:$0xff] }
 0x75d   : > { %v1332_v8 = vpop.xlane.xlu0 %1331  ;;  %v1329_v5 = vpop.xlane.xlu1 %1328 }
 0x75e   : > { %v1362_v4 = vadd.f32 %v1361_v3, %v1329_v5 }
 0x760   : > { %v1363_v10 = vadd.f32 %v1362_v4, %v1332_v8 }
 0x761   : > { %v1338_v15 = vpop.xlane.xlu0 %1337  ;;  %v1335_v16 = vpop.xlane.xlu1 %1334 }
 0x762   : > { %v1364_v17 = vadd.f32 %v1363_v10, %v1335_v16  ;;  %v1918_v10 = vld [vmem:[%s2979_s7 + $0x8] ss:$0 sm:$0xff]  ;;  %v1920_v16 = vld [vmem:[%s2979_s7 + $0xa] ss:$0 sm:$0xff] }
 0x764   : > { %v1365_v40 = vadd.f32 %v1364_v17, %v1338_v15  ;;  %v1919_v15 = vld [vmem:[%s2979_s7 + $0x9] ss:$0 sm:$0xff]  ;;  %v1921_v17 = vld [vmem:[%s2979_s7 + $0xb] ss:$0 sm:$0xff] }
 0x765   : > { %v1344_v41 = vpop.xlane.xlu0 %1343  ;;  %v1341_v13 = vpop.xlane.xlu1 %1340 }
 0x766   : > { %v1366_v12 = vadd.f32 %v1365_v40, %v1341_v13  ;;  %v1922_v40 = vld [vmem:[%s2979_s7 + $0xc] ss:$0 sm:$0xff]  ;;  %v1924_v13 = vld [vmem:[%s2979_s7 + $0xe] ss:$0 sm:$0xff] }
 0x768   : > { %v1367_v11 = vadd.f32 %v1366_v12, %v1344_v41  ;;  %v1923_v41 = vld [vmem:[%s2979_s7 + $0xd] ss:$0 sm:$0xff]  ;;  %v1925_v12 = vld [vmem:[%s2979_s7 + $0xf] ss:$0 sm:$0xff] }
 0x769   : > { %v1350_v19 = vpop.xlane.xlu0 %1349  ;;  %v1347_v20 = vpop.xlane.xlu1 %1346 }
 0x76a   : > { %v1368_v21 = vadd.f32 %v1367_v11, %v1347_v20  ;;  %v1926_v11 = vld [vmem:[%s2980_s8] ss:$0 sm:$0xff]  ;;  %v1928_v20 = vld [vmem:[%s2980_s8 + $0x2] ss:$0 sm:$0xff] }
 0x76c   : > { %v1369_v44 = vadd.f32 %v1368_v21, %v1350_v19  ;;  %v1927_v19 = vld [vmem:[%s2980_s8 + $0x1] ss:$0 sm:$0xff]  ;;  %v1929_v21 = vld [vmem:[%s2980_s8 + $0x3] ss:$0 sm:$0xff] }
 0x76d   : > { %v1353_v46 = vpop.xlane.xlu1 %1352  ;;  %v1356_v45 = vpop.xlane.xlu0 %1355 }
 0x76e   : > { %v1370_v42 = vadd.f32 %v1369_v44, %v1353_v46 }
 0x770   : > { %v1371_v47 = vadd.f32 %v1370_v42, %v1356_v45  ;;  %v1932_v42 = vld [vmem:[%s2980_s8 + $0x6] ss:$0 sm:$0xff] }
 0x772   : > { %v1372_v49 = vmul.f32 0.001953125, %v1371_v47 }
 0x774   : > { %v1373_v56 = vadd.f32 1e-05, %v1372_v49 }
 0x776   : > { %2189 = vrsqrt.f32 %v1373_v56 }
 0x780   : > { %v2190_v59 = vpop.eup %2189 }
 0x781   : > { %v1375_v3 = vmul.f32 %v2190_v59, %v2687_v53  ;;  %v1376_v8 = vmul.f32 %v2190_v59, %v2684_v51  ;;  %v1377_v5 = vmul.f32 %v2190_v59, %v2693_v55  ;;  %v1378_v4 = vmul.f32 %v2190_v59, %v2690_v54 }
 0x782   : > { %v1379_v53 = vmul.f32 %v2190_v59, %v2703_v50  ;;  %v1380_v51 = vmul.f32 %v2190_v59, %v2700_v60  ;;  %v1381_v55 = vmul.f32 %v2190_v59, %v2715_v63  ;;  %v1382_v54 = vmul.f32 %v2190_v59, %v2712_v0 }
 0x783   : > { %v1383_v50 = vmul.f32 %v2190_v59, %v2733_v9  ;;  %v1384_v60 = vmul.f32 %v2190_v59, %v2730_v6  ;;  %v1385_v63 = vmul.f32 %v2190_v59, %v2745_v14  ;;  %v1386_v0 = vmul.f32 %v2190_v59, %v2742_v38 }
 0x784   : > { %v1387_v9 = vmul.f32 %v2190_v59, %v2751_v39  ;;  %v1388_v6 = vmul.f32 %v2190_v59, %v2748_v7  ;;  %v1389_v14 = vmul.f32 %v2190_v59, %v2763_v43  ;;  %v1390_v38 = vmul.f32 %v2190_v59, %v2760_v18  ;;  %v1930_v18 = vld [vmem:[%s2980_s8 + $0x4] ss:$0 sm:$0xff]  ;;  %v1931_v43 = vld [vmem:[%s2980_s8 + $0x5] ss:$0 sm:$0xff]  ;;  %v1933_v59 = vld [vmem:[%s2980_s8 + $0x7] ss:$0 sm:$0xff] }
 0x785   : > { %v1503_v44 = vmul.f32 %v1910_v52, %v1375_v3  ;;  %v1504_v39 = vmul.f32 %v1911_v58, %v1376_v8  ;;  %v1505_v46 = vmul.f32 %v1912_v57, %v1377_v5  ;;  %v1506_v7 = vmul.f32 %v1913_v61, %v1378_v4  ;;  %v1934_v52 = vld [vmem:[%s2980_s8 + $0x8] ss:$0 sm:$0xff]  ;;  %v1935_v58 = vld [vmem:[%s2980_s8 + $0x9] ss:$0 sm:$0xff] }
 0x786   : > { %v1507_v45 = vmul.f32 %v1914_v62, %v1379_v53  ;;  %v1508_v47 = vmul.f32 %v1915_v48, %v1380_v51  ;;  %v1509_v49 = vmul.f32 %v1916_v1, %v1381_v55  ;;  %v1510_v56 = vmul.f32 %v1917_v2, %v1382_v54  ;;  %v1936_v62 = vld [vmem:[%s2980_s8 + $0xa] ss:$0 sm:$0xff]  ;;  %v1937_v48 = vld [vmem:[%s2980_s8 + $0xb] ss:$0 sm:$0xff]  ;;  %v1938_v1 = vld [vmem:[%s2980_s8 + $0xc] ss:$0 sm:$0xff] }
 0x787   : > { %v1511_v57 = vmul.f32 %v1918_v10, %v1383_v50  ;;  %v1512_v61 = vmul.f32 %v1919_v15, %v1384_v60  ;;  %v1513_v3 = vmul.f32 %v1920_v16, %v1385_v63  ;;  %v1514_v8 = vmul.f32 %v1921_v17, %v1386_v0  ;;  %v1939_v10 = vld [vmem:[%s2980_s8 + $0xd] ss:$0 sm:$0xff]  ;;  %v1940_v15 = vld [vmem:[%s2980_s8 + $0xe] ss:$0 sm:$0xff]  ;;  %v1941_v16 = vld [vmem:[%s2980_s8 + $0xf] ss:$0 sm:$0xff] }
 0x788   : > { %v1515_v2 = vmul.f32 %v1922_v40, %v1387_v9  ;;  %v1516_v5 = vmul.f32 %v1923_v41, %v1388_v6  ;;  %v1517_v4 = vmul.f32 %v1924_v13, %v1389_v14  ;;  %v1518_v53 = vmul.f32 %v1925_v12, %v1390_v38 }
 0x789   : > { %v1631_v51 = vadd.f32 %v1926_v11, %v1503_v44  ;;  %v1632_v55 = vadd.f32 %v1927_v19, %v1504_v39  ;;  %v1633_v54 = vadd.f32 %v1928_v20, %v1505_v46  ;;  %v1634_v17 = vadd.f32 %v1929_v21, %v1506_v7 }
 0x78a   : > { %v1635_v40 = vadd.f32 %v1930_v18, %v1507_v45  ;;  %v1636_v41 = vadd.f32 %v1931_v43, %v1508_v47  ;;  %v1637_v50 = vadd.f32 %v1932_v42, %v1509_v49  ;;  %v1638_v60 = vadd.f32 %v1933_v59, %v1510_v56 }
 0x78b   : > { %v1639_v63 = vadd.f32 %v1934_v52, %v1511_v57  ;;  %v1640_v0 = vadd.f32 %v1935_v58, %v1512_v61  ;;  %v1641_v13 = vadd.f32 %v1936_v62, %v1513_v3  ;;  %v1642_v12 = vadd.f32 %v1937_v48, %v1514_v8 }
 0x78c   : > { %v1643_v9 = vadd.f32 %v1938_v1, %v1515_v2  ;;  %v1644_v6 = vadd.f32 %v1939_v10, %v1516_v5  ;;  %v1645_v14 = vadd.f32 %v1940_v15, %v1517_v4  ;;  %v1646_v38 = vadd.f32 %v1941_v16, %v1518_v53 }
 0x78d   : > { %v1647_v11 = vadd.f32 %v1631_v51, %v2393_v22  ;;  %v1648_v19 = vadd.f32 %v1632_v55, %v2403_v24  ;;  %v1649_v20 = vadd.f32 %v1633_v54, %v2409_v26  ;;  %v1650_v21 = vadd.f32 %v1634_v17, %v2423_v28 }
 0x78e   : > { %v1651_v44 = vadd.f32 %v1635_v40, %v2429_v30  ;;  %v1652_v39 = vadd.f32 %v1636_v41, %v2443_v32  ;;  %v1653_v46 = vadd.f32 %v1637_v50, %v2449_v34  ;;  %v1654_v7 = vadd.f32 %v1638_v60, %v2463_v36 }
 0x78f   : > { %v1655_v22 = vadd.f32 %v1639_v63, %v2396_v23  ;;  %v1656_v24 = vadd.f32 %v1640_v0, %v2406_v25  ;;  %v1657_v26 = vadd.f32 %v1641_v13, %v2412_v27  ;;  %v1658_v28 = vadd.f32 %v1642_v12, %v2426_v29  ;;  %1663 = vst.msk [vmem:[%s2496_s15] sm:$0xff] %vm448_vm0, %v1647_v11 }
 0x790   : > { %1664 = vst.msk [vmem:[%s2496_s15 + $0x8] sm:$0xff] %vm448_vm0, %v1648_v19  ;;  %1665 = vst.msk [vmem:[%s2496_s15 + $0x10] sm:$0xff] %vm448_vm0, %v1649_v20  ;;  %v1659_v23 = vadd.f32 %v1643_v9, %v2432_v31  ;;  %v1660_v25 = vadd.f32 %v1644_v6, %v2446_v33  ;;  %v1661_v27 = vadd.f32 %v1645_v14, %v2452_v35 }
 0x791   : > { %1666 = vst.msk [vmem:[%s2496_s15 + $0x18] sm:$0xff] %vm448_vm0, %v1650_v21  ;;  %v1662_v29 = vadd.f32 %v1646_v38, %v2466_v37  ;;  %1667 = vst.msk [vmem:[%s2496_s15 + $0x20] sm:$0xff] %vm448_vm0, %v1651_v44  ;;  %1685 = sbr.rel (!%p2344_p5) target bundleno = 1952 (0x7a0), region = 105 }
 0x792   : > { %1668 = vst.msk [vmem:[%s2496_s15 + $0x28] sm:$0xff] %vm448_vm0, %v1652_v39  ;;  %1669 = vst.msk [vmem:[%s2496_s15 + $0x30] sm:$0xff] %vm448_vm0, %v1653_v46 }
 0x793   : > { %1670 = vst.msk [vmem:[%s2496_s15 + $0x38] sm:$0xff] %vm448_vm0, %v1654_v7  ;;  %1671 = vst.msk [vmem:[%s2496_s15 + $0x40] sm:$0xff] %vm448_vm0, %v1655_v22 }
 0x794   : > { %1672 = vst.msk [vmem:[%s2496_s15 + $0x48] sm:$0xff] %vm448_vm0, %v1656_v24  ;;  %1673 = vst.msk [vmem:[%s2496_s15 + $0x50] sm:$0xff] %vm448_vm0, %v1657_v26 }
 0x795   : > { %1674 = vst.msk [vmem:[%s2496_s15 + $0x58] sm:$0xff] %vm448_vm0, %v1658_v28  ;;  %1675 = vst.msk [vmem:[%s2496_s15 + $0x60] sm:$0xff] %vm448_vm0, %v1659_v23 }
 0x796   : > { %1676 = vst.msk [vmem:[%s2496_s15 + $0x68] sm:$0xff] %vm448_vm0, %v1660_v25  ;;  %1677 = vst.msk [vmem:[%s2496_s15 + $0x70] sm:$0xff] %vm448_vm0, %v1661_v27  ;;  %v1745_v30 = vld [vmem:[%s2496_s15] sm:$0xff] (%p2344_p5) }
 0x797   : > { %1678 = vst.msk [vmem:[%s2496_s15 + $0x78] sm:$0xff] %vm448_vm0, %v1662_v29  ;;  %v1747_v31 = vld [vmem:[%s2496_s15 + $0x8] sm:$0xff] (%p2344_p5)  ;;  %v1749_v32 = vld [vmem:[%s2496_s15 + $0x10] sm:$0xff] (%p2344_p5)  ;;  %1746 = vst [vmem:[%s1687_s17] sm:$0xff] (%p2344_p5), %v1745_v30 }
 0x798   : > { %v1751_v33 = vld [vmem:[%s2496_s15 + $0x18] sm:$0xff]  ;;  %v1753_v34 = vld [vmem:[%s2496_s15 + $0x20] sm:$0xff]  ;;  %1748 = vst [vmem:[%s1687_s17 + $0x10] sm:$0xff] %v1747_v31  ;;  %1750 = vst [vmem:[%s1687_s17 + $0x20] sm:$0xff] %v1749_v32 }
 0x799   : > { %v1755_v35 = vld [vmem:[%s2496_s15 + $0x28] sm:$0xff]  ;;  %1752 = vst [vmem:[%s1687_s17 + $0x30] sm:$0xff] %v1751_v33  ;;  %1754 = vst [vmem:[%s1687_s17 + $0x40] sm:$0xff] %v1753_v34  ;;  %v1757_v36 = vld [vmem:[%s2496_s15 + $0x30] sm:$0xff] }
 0x79a   : > { %1756 = vst [vmem:[%s1687_s17 + $0x50] sm:$0xff] %v1755_v35  ;;  %v1759_v37 = vld [vmem:[%s2496_s15 + $0x38] sm:$0xff]  ;;  %v1761_v18 = vld [vmem:[%s2496_s15 + $0x40] sm:$0xff]  ;;  %1758 = vst [vmem:[%s1687_s17 + $0x60] sm:$0xff] %v1757_v36 }
 0x79b   : > { %1760 = vst [vmem:[%s1687_s17 + $0x70] sm:$0xff] %v1759_v37  ;;  %1762 = vst [vmem:[%s1687_s17 + $0x80] sm:$0xff] %v1761_v18  ;;  %v1763_v43 = vld [vmem:[%s2496_s15 + $0x48] sm:$0xff]  ;;  %v1765_v42 = vld [vmem:[%s2496_s15 + $0x50] sm:$0xff] }
 0x79c   : > { %v1767_v45 = vld [vmem:[%s2496_s15 + $0x58] sm:$0xff]  ;;  %1764 = vst [vmem:[%s1687_s17 + $0x90] sm:$0xff] %v1763_v43  ;;  %1766 = vst [vmem:[%s1687_s17 + $0xa0] sm:$0xff] %v1765_v42  ;;  %v1769_v47 = vld [vmem:[%s2496_s15 + $0x60] sm:$0xff] }
 0x79d   : > { %1768 = vst [vmem:[%s1687_s17 + $0xb0] sm:$0xff] %v1767_v45  ;;  %v1771_v49 = vld [vmem:[%s2496_s15 + $0x68] sm:$0xff]  ;;  %v1773_v56 = vld [vmem:[%s2496_s15 + $0x70] sm:$0xff]  ;;  %1770 = vst [vmem:[%s1687_s17 + $0xc0] sm:$0xff] %v1769_v47 }
 0x79e   : > { %1772 = vst [vmem:[%s1687_s17 + $0xd0] sm:$0xff] %v1771_v49  ;;  %1774 = vst [vmem:[%s1687_s17 + $0xe0] sm:$0xff] %v1773_v56  ;;  %v1775_v59 = vld [vmem:[%s2496_s15 + $0x78] sm:$0xff] }
 0x79f   : > { %1776 = vst [vmem:[%s1687_s17 + $0xf0] sm:$0xff] %v1775_v59 }
 0x7a0 PF: > { %p16_p11 = scmp.ge.s32.totalorder %s2331_s13, 4   ;;  %s2983_s30 = smov %s2229_s10 }
 0x7a1   : > { %s2984_s10 = smov %s2342_s16  ;;  %s2985_s11 = smov %s2331_s13 }
 0x7a2   :  { %18 = sbr.rel (!%p16_p11) target bundleno = 2 (0x2), region = 189 }

</bundles_post_ra>
